<compile_context>
chip_gen: v5e
topology: v5e:2x2
jax: 0.10.0
libtpu: 0.0.40
codegen_flags: <defaults>
</compile_context>

<pallas_src>
import math

import numpy as np
import jax
import jax.numpy as jnp
from jax.experimental import pallas as pl
from jax.experimental.pallas import tpu as pltpu

NEG_INF = -1e9  # matches torch masked_fill(-1000000000.0)


# ----------------------------------------------------------------------------
# Kernel 1: packed bidirectional 2-layer GRU.
#   emb  : (S, B, E)    lens: (B, 1) int32
#   pade : (S, B, H2)   = fwd_l1 + bwd_l1 (the torch "sum the two halves"),
#                         zeros at padded timesteps (pad_packed semantics).
# ----------------------------------------------------------------------------
def gru_kernel(emb_ref, len_ref,
               wih0f_ref, whh0f_ref, bih0f_ref, bhh0f_ref,
               wih0b_ref, whh0b_ref, bih0b_ref, bhh0b_ref,
               wih1f_ref, whh1f_ref, bih1f_ref, bhh1f_ref,
               wih1b_ref, whh1b_ref, bih1b_ref, bhh1b_ref,
               pade_ref,
               of0_ref, ob0_ref, h_ref):
    S, B, H2 = pade_ref.shape
    lens = len_ref[...]                                   # (B, 1) int32

    # hoisted, loop-invariant weight loads
    wih0f = wih0f_ref[...]; whh0f = whh0f_ref[...]
    bih0f = bih0f_ref[...]; bhh0f = bhh0f_ref[...]
    wih0b = wih0b_ref[...]; whh0b = whh0b_ref[...]
    bih0b = bih0b_ref[...]; bhh0b = bhh0b_ref[...]
    wih1f = wih1f_ref[...]; whh1f = whh1f_ref[...]
    bih1f = bih1f_ref[...]; bhh1f = bhh1f_ref[...]
    wih1b = wih1b_ref[...]; whh1b = whh1b_ref[...]
    bih1b = bih1b_ref[...]; bhh1b = bhh1b_ref[...]
    # split layer-1 input weights (fwd-half / bwd-half) -> no lane concat of inputs
    wih1f_a, wih1f_b = wih1f[:H2, :], wih1f[H2:, :]
    wih1b_a, wih1b_b = wih1b[:H2, :], wih1b[H2:, :]

    def cell(gi, h, whh, bhh):
        # PyTorch GRU gate order [r | z | n]
        gh = jnp.dot(h, whh, preferred_element_type=jnp.float32) + bhh
        r = jax.nn.sigmoid(gi[:, :H2] + gh[:, :H2])
        z = jax.nn.sigmoid(gi[:, H2:2 * H2] + gh[:, H2:2 * H2])
        n = jnp.tanh(gi[:, 2 * H2:] + r * gh[:, 2 * H2:])
        return (1.0 - z) * n + z * h

    # ---- layer 0, forward direction ----
    h_ref[...] = jnp.zeros_like(h_ref)

    @pl.loop(0, S)
    def _(t):
        valid = t < lens                                  # (B, 1) bool
        gi = jnp.dot(emb_ref[t], wih0f, preferred_element_type=jnp.float32) + bih0f
        h = h_ref[...]
        hn = jnp.where(valid, cell(gi, h, whh0f, bhh0f), h)
        h_ref[...] = hn
        of0_ref[t] = jnp.where(valid, hn, 0.0)

    # ---- layer 0, backward direction ----
    h_ref[...] = jnp.zeros_like(h_ref)

    @pl.loop(0, S)
    def _(i):
        t = S - 1 - i
        valid = t < lens
        gi = jnp.dot(emb_ref[t], wih0b, preferred_element_type=jnp.float32) + bih0b
        h = h_ref[...]
        hn = jnp.where(valid, cell(gi, h, whh0b, bhh0b), h)
        h_ref[...] = hn
        ob0_ref[t] = jnp.where(valid, hn, 0.0)

    # ---- layer 1, forward (input = [fwd_l0 | bwd_l0] via split matmul) ----
    h_ref[...] = jnp.zeros_like(h_ref)

    @pl.loop(0, S)
    def _(t):
        valid = t < lens
        gi = (jnp.dot(of0_ref[t], wih1f_a, preferred_element_type=jnp.float32)
              + jnp.dot(ob0_ref[t], wih1f_b, preferred_element_type=jnp.float32)
              + bih1f)
        h = h_ref[...]
        hn = jnp.where(valid, cell(gi, h, whh1f, bhh1f), h)
        h_ref[...] = hn
        pade_ref[t] = jnp.where(valid, hn, 0.0)

    # ---- layer 1, backward; accumulate (torch sums the two output halves) ----
    h_ref[...] = jnp.zeros_like(h_ref)

    @pl.loop(0, S)
    def _(i):
        t = S - 1 - i
        valid = t < lens
        gi = (jnp.dot(of0_ref[t], wih1b_a, preferred_element_type=jnp.float32)
              + jnp.dot(ob0_ref[t], wih1b_b, preferred_element_type=jnp.float32)
              + bih1b)
        h = h_ref[...]
        hn = jnp.where(valid, cell(gi, h, whh1b, bhh1b), h)
        h_ref[...] = hn
        pade_ref[t] = pade_ref[t] + jnp.where(valid, hn, 0.0)


# ----------------------------------------------------------------------------
# Kernel 2: category gather + 8 fused GAT heads + transformer EncoderLayer +
#           sequence max-pool.
# ----------------------------------------------------------------------------
def encoder_kernel(pade_ref, gw_ref, padmask_ref, padhid_ref, adj_ref,
                   wa1_ref, wa2_ref, pos_ref, mask_ref,
                   ln_a_ref, ln_b_ref,
                   wq_ref, bq_ref, wk_ref, bk_ref, wv_ref, bv_ref, wx_ref, bx_ref,
                   w1_ref, b1_ref, w2_ref, b2_ref,
                   out_ref, prob_ref):
    B = pade_ref.shape[0]
    N = adj_ref.shape[1]
    H2 = pade_ref.shape[2]
    S = out_ref.shape[1]
    H = out_ref.shape[2]
    NG = wa1_ref.shape[1]        # 8 GAT heads
    NH = wq_ref.shape[0]         # 16 attention heads
    DV = wv_ref.shape[2]         # value_dim = 32
    DK = wq_ref.shape[2]         # key_dim   = 12

    pade = pade_ref[...]                                             # (B, S, H2)

    # --- category node embeddings: mean over matched word positions (dense
    #     mean-weights), padding rows get the category-embedding pad vector ---
    cat_emb = jnp.einsum('bcs,bsh->bch', gw_ref[...], pade,
                         preferred_element_type=jnp.float32)
    cat_emb = cat_emb + padmask_ref[...][:, :, None] * padhid_ref[...][None, :, :]
    x_g = jnp.concatenate([pade, cat_emb], axis=1)                   # (B, N, H2)

    # --- 8 fused GAT heads: scores via pre-folded (W_k @ a1_k / a2_k) vectors,
    #     so neither h nor the (B,N,N,2F) pair-concat is ever materialized ---
    xg2 = x_g.reshape(B * N, H2)
    s1 = jnp.dot(xg2, wa1_ref[...], preferred_element_type=jnp.float32).reshape(B, N, NG)
    s2 = jnp.dot(xg2, wa2_ref[...], preferred_element_type=jnp.float32).reshape(B, N, NG)
    adj = adj_ref[...]
    know = jnp.zeros((B, N, H2), jnp.float32)
    for k in range(NG):
        e = s1[:, :, k][:, :, None] + s2[:, :, k][:, None, :]        # (B, N, N)
        e = jnp.where(e > 0, e, 0.1 * e)                             # LeakyReLU(0.1)
        e = jnp.where(adj > 0.5, e, NEG_INF)
        m = jnp.max(e, axis=-1, keepdims=True)
        p = jnp.exp(e - m)
        a = p / jnp.sum(p, axis=-1, keepdims=True)
        know = know + jnp.einsum('bij,bjh->bih', a, x_g,
                                 preferred_element_type=jnp.float32)
    know = know * (1.0 / NG)                                         # mean over heads

    # --- concat positional embedding to form the transformer input ---
    x = jnp.concatenate([know, pos_ref[...]], axis=2)                # (B, N, H)
    x2 = x.reshape(B * N, H)

    ln_a = ln_a_ref[...]
    ln_b = ln_b_ref[...]

    def layer_norm(y):                                               # torch LayerNorm (unbiased std, eps on std)
        mean = jnp.mean(y, axis=-1, keepdims=True)
        d = y - mean
        var = jnp.sum(d * d, axis=-1, keepdims=True) * (1.0 / (H - 1))
        return ln_a * d / (jnp.sqrt(var) + 1e-6) + ln_b

    # --- multi-head attention (per-head pre-split weights; output projection
    #     applied per head so the 512-wide head-concat never exists) ---
    xn = layer_norm(x2)
    maskb = mask_ref[...][:, None, :] > 0.5                          # (B, 1, N)
    scale = 1.0 / math.sqrt(DK)
    attn_out = jnp.zeros((B * N, H), jnp.float32)
    for k in range(NH):
        q = (jnp.dot(xn, wq_ref[k], preferred_element_type=jnp.float32) + bq_ref[k]).reshape(B, N, DK)
        kk = (jnp.dot(xn, wk_ref[k], preferred_element_type=jnp.float32) + bk_ref[k]).reshape(B, N, DK)
        v = (jnp.dot(xn, wv_ref[k], preferred_element_type=jnp.float32) + bv_ref[k]).reshape(B, N, DV)
        sc = jnp.einsum('bqd,bkd->bqk', q, kk, preferred_element_type=jnp.float32) * scale
        sc = jnp.where(maskb, sc, NEG_INF)
        m = jnp.max(sc, axis=-1, keepdims=True)
        p = jnp.exp(sc - m)
        a = p / jnp.sum(p, axis=-1, keepdims=True)
        ctx = jnp.einsum('bqk,bkd->bqd', a, v, preferred_element_type=jnp.float32)
        attn_out = attn_out + jnp.dot(ctx.reshape(B * N, DV), wx_ref[k],
                                      preferred_element_type=jnp.float32)
    attn_out = attn_out + bx_ref[...]

    # --- residual + LayerNorm + FFN + residual ---
    context = x2 + attn_out
    cn = layer_norm(context)
    hid = jnp.maximum(jnp.dot(cn, w1_ref[...], preferred_element_type=jnp.float32) + b1_ref[...], 0.0)
    ff = jnp.dot(hid, w2_ref[...], preferred_element_type=jnp.float32) + b2_ref[...]
    out = (context + ff).reshape(B, N, H)

    out_s = out[:, :S, :]                                            # trim category slots
    out_ref[...] = out_s
    prob_ref[...] = jnp.max(out_s, axis=1)                           # max_pool1d over seq


# ----------------------------------------------------------------------------
# Wrapper: glue (embedding lookup, python-list flattening, pos table, masks)
# plus the two pallas_calls.
# ----------------------------------------------------------------------------
def encoder_seq_forward(params, input_seqs, input_lengths,
                        cate_word_edge, cate_index_input, cate_length, cate_id_match):
    S, B = input_seqs.shape
    H2 = params["gru"]["whh0f"].shape[0]
    H = 2 * H2
    C = int(max(cate_length))
    N = S + C

    # TODO(synk): nn.Embedding lookup, pack_padded bookkeeping, positional table
    # and the nested cate_id_match python lists are host/XLA glue, not Pallas.
    embedded = jnp.take(params["embedding"], jnp.asarray(input_seqs, jnp.int32), axis=0)  # (S,B,E)
    lens = jnp.asarray(np.asarray(input_lengths, np.int32).reshape(B, 1))

    vmem = pl.BlockSpec(memory_space=pltpu.MemorySpace.VMEM)

    g = params["gru"]
    gru_inputs = (embedded, lens,
                  g["wih0f"], g["whh0f"], g["bih0f"], g["bhh0f"],
                  g["wih0b"], g["whh0b"], g["bih0b"], g["bhh0b"],
                  g["wih1f"], g["whh1f"], g["bih1f"], g["bhh1f"],
                  g["wih1b"], g["whh1b"], g["bih1b"], g["bhh1b"])
    pade = pl.pallas_call(
        gru_kernel,
        out_shape=jax.ShapeDtypeStruct((S, B, H2), jnp.float32),
        in_specs=[vmem] * len(gru_inputs),
        out_specs=vmem,
        scratch_shapes=[pltpu.VMEM((S, B, H2), jnp.float32),
                        pltpu.VMEM((S, B, H2), jnp.float32),
                        pltpu.VMEM((B, H2), jnp.float32)],
    )(*gru_inputs)
    pade_b = jnp.transpose(pade, (1, 0, 2))                           # (B, S, H2)

    # dense mean-gather weights for the category nodes
    gw = np.zeros((B, C, S), np.float32)
    padmask = np.ones((B, C), np.float32)
    for b in range(B):
        for i in range(min(int(cate_length[b]), C)):
            ids = cate_id_match[b][i]
            for j in ids:
                gw[b, i, j] = 1.0 / len(ids)
            padmask[b, i] = 0.0
    padhid = params["category_embedding"][0:1, :]                     # padding_idx row

    # positional encoding (rows 1..len, zeros elsewhere incl. category slots)
    pos = np.zeros((B, N, H2), np.float32)
    table = params["pos_table"]
    for b in range(B):
        L = int(input_lengths[b])
        pos[b, :L, :] = table[1:L + 1, :]

    src_mask = (np.asarray(input_seqs).T != 0).astype(np.float32)     # (B, S)
    cat_mask = (np.asarray(cate_index_input) != 0).astype(np.float32) # (B, C)
    mask = np.concatenate([src_mask, cat_mask], axis=1)               # (B, N)

    t = params["transformer"]
    enc_inputs = (pade_b, jnp.asarray(gw), jnp.asarray(padmask), padhid,
                  jnp.asarray(cate_word_edge, jnp.float32),
                  params["gat_wa1"], params["gat_wa2"],
                  jnp.asarray(pos), jnp.asarray(mask),
                  t["ln_a"], t["ln_b"],
                  t["wq"], t["bq"], t["wk"], t["bk"], t["wv"], t["bv"], t["wx"], t["bx"],
                  t["w1"], t["b1"], t["w2"], t["b2"])
    out, problem = pl.pallas_call(
        encoder_kernel,
        out_shape=(jax.ShapeDtypeStruct((B, S, H), jnp.float32),
                   jax.ShapeDtypeStruct((B, H), jnp.float32)),
        in_specs=[vmem] * len(enc_inputs),
        out_specs=(vmem, vmem),
    )(*enc_inputs)

    return jnp.transpose(out, (1, 0, 2)), problem                     # (S,B,H), (B,H)


if __name__ == "__main__":
    B, S, E, H = 2, 8, 32, 32
    H2 = H // 2
    V = 20                      # vocab / input_size
    CAT_SIZE = 5
    NH, DK, DV = 16, 12, 32     # MultiHeadAttention heads / key_dim / value_dim
    NGAT = 8

    keys = iter(jax.random.split(jax.random.PRNGKey(0), 64))

    def nrm(shape, scale=0.1):
        return (scale * jax.random.normal(next(keys), shape)).astype(jnp.float32)

    # ---- parameters ----
    embedding = nrm((V, E), 1.0).at[0].set(0.0)                       # padding_idx=0
    category_embedding = nrm((CAT_SIZE, H2), 1.0).at[0].set(0.0)      # padding_idx=0

    gru = {}
    for name, in_dim in (("0f", E), ("0b", E), ("1f", 2 * H2), ("1b", 2 * H2)):
        gru["wih" + name] = nrm((in_dim, 3 * H2), 0.3)
        gru["whh" + name] = nrm((H2, 3 * H2), 0.3)
        gru["bih" + name] = nrm((1, 3 * H2), 0.1)
        gru["bhh" + name] = nrm((1, 3 * H2), 0.1)

    gat_W = nrm((NGAT, H2, H2), 0.3)
    gat_a1 = nrm((NGAT, H2, 1), 0.3)
    gat_a2 = nrm((NGAT, H2, 1), 0.3)
    gat_wa1 = jnp.concatenate([jnp.dot(gat_W[k], gat_a1[k]) for k in range(NGAT)], axis=1)
    gat_wa2 = jnp.concatenate([jnp.dot(gat_W[k], gat_a2[k]) for k in range(NGAT)], axis=1)

    trans = dict(
        ln_a=jnp.ones((1, H), jnp.float32), ln_b=jnp.zeros((1, H), jnp.float32),
        wq=nrm((NH, H, DK), 0.2), bq=nrm((NH, 1, DK), 0.1),
        wk=nrm((NH, H, DK), 0.2), bk=nrm((NH, 1, DK), 0.1),
        wv=nrm((NH, H, DV), 0.2), bv=nrm((NH, 1, DV), 0.1),
        wx=nrm((NH, DV, H), 0.2), bx=nrm((1, H), 0.1),
        w1=nrm((H, H), 0.2), b1=nrm((1, H), 0.1),
        w2=nrm((H, H), 0.2), b2=nrm((1, H), 0.1),
    )

    # positional-encoding table (d_model = H/2, row 0 = pad zeros)
    d_model, max_seq_len = H2, 160
    pe = np.array([[p / np.power(10000.0, 2.0 * (j // 2) / d_model) for j in range(d_model)]
                   for p in range(max_seq_len)], dtype=np.float64)
    pe[:, 0::2] = np.sin(pe[:, 0::2])
    pe[:, 1::2] = np.cos(pe[:, 1::2])
    pos_table = np.concatenate([np.zeros((1, d_model)), pe], axis=0).astype(np.float32)

    params = dict(embedding=embedding, category_embedding=category_embedding,
                  gru=gru, gat_wa1=gat_wa1, gat_wa2=gat_wa2,
                  transformer=trans, pos_table=pos_table)

    # ---- deterministic example inputs ----
    input_lengths = [8, 6]                                            # sorted descending (packed)
    cate_length = [2, 1]
    C = max(cate_length)
    N = S + C
    input_seqs = np.array(jax.random.randint(next(keys), (S, B), 1, V), np.int32)
    for b in range(B):
        input_seqs[input_lengths[b]:, b] = 0                          # pad token 0
    cate_index_input = np.array([[3, 4], [2, 0]], np.int32)
    cate_id_match = [[[0, 1], [2, 3, 4]], [[1, 2]]]
    adj = np.array(jax.random.uniform(next(keys), (B, N, N)) > 0.5, np.float32)
    for i in range(N):
        adj[:, i, i] = 1.0                                            # keep every row attendable
    cate_word_edge = jnp.asarray(adj)

    out, problem = encoder_seq_forward(params, input_seqs, input_lengths,
                                       cate_word_edge, cate_index_input,
                                       cate_length, cate_id_match)
    out, problem = jax.block_until_ready((out, problem))

    assert out.shape == (S, B, H) and problem.shape == (B, H)
    assert bool(jnp.all(jnp.isfinite(out))) and bool(jnp.all(jnp.isfinite(problem)))
    print("KERNEL_OK")
</pallas_src>

<mosaic_0001>
module attributes {stable_mosaic.version = 11 : i64} {
  func.func @gru_kernel(%arg0: memref<8x2x32xf32, #tpu.memory_space<vmem>>, %arg1: memref<2x1xi32, #tpu.memory_space<vmem>>, %arg2: memref<32x48xf32, #tpu.memory_space<vmem>>, %arg3: memref<16x48xf32, #tpu.memory_space<vmem>>, %arg4: memref<1x48xf32, #tpu.memory_space<vmem>>, %arg5: memref<1x48xf32, #tpu.memory_space<vmem>>, %arg6: memref<32x48xf32, #tpu.memory_space<vmem>>, %arg7: memref<16x48xf32, #tpu.memory_space<vmem>>, %arg8: memref<1x48xf32, #tpu.memory_space<vmem>>, %arg9: memref<1x48xf32, #tpu.memory_space<vmem>>, %arg10: memref<32x48xf32, #tpu.memory_space<vmem>>, %arg11: memref<16x48xf32, #tpu.memory_space<vmem>>, %arg12: memref<1x48xf32, #tpu.memory_space<vmem>>, %arg13: memref<1x48xf32, #tpu.memory_space<vmem>>, %arg14: memref<32x48xf32, #tpu.memory_space<vmem>>, %arg15: memref<16x48xf32, #tpu.memory_space<vmem>>, %arg16: memref<1x48xf32, #tpu.memory_space<vmem>>, %arg17: memref<1x48xf32, #tpu.memory_space<vmem>>, %arg18: memref<8x2x16xf32, #tpu.memory_space<vmem>>, %arg19: memref<8x2x16xf32, #tpu.memory_space<vmem>>, %arg20: memref<8x2x16xf32, #tpu.memory_space<vmem>>, %arg21: memref<2x16xf32, #tpu.memory_space<vmem>>) attributes {dimension_semantics = [], scalar_prefetch = 0 : i64, scratch_operands = 3 : i64, tpu.core_type = #tpu.core_type<tc>} {
    %c0 = arith.constant 0 : index
    %c0_0 = arith.constant 0 : index
    %0 = vector.load %arg1[%c0, %c0_0] : memref<2x1xi32, #tpu.memory_space<vmem>>, vector<2x1xi32>
    %c0_1 = arith.constant 0 : index
    %c0_2 = arith.constant 0 : index
    %1 = vector.load %arg2[%c0_1, %c0_2] : memref<32x48xf32, #tpu.memory_space<vmem>>, vector<32x48xf32>
    %c0_3 = arith.constant 0 : index
    %c0_4 = arith.constant 0 : index
    %2 = vector.load %arg3[%c0_3, %c0_4] : memref<16x48xf32, #tpu.memory_space<vmem>>, vector<16x48xf32>
    %c0_5 = arith.constant 0 : index
    %c0_6 = arith.constant 0 : index
    %3 = vector.load %arg4[%c0_5, %c0_6] : memref<1x48xf32, #tpu.memory_space<vmem>>, vector<1x48xf32>
    %c0_7 = arith.constant 0 : index
    %c0_8 = arith.constant 0 : index
    %4 = vector.load %arg5[%c0_7, %c0_8] : memref<1x48xf32, #tpu.memory_space<vmem>>, vector<1x48xf32>
    %c0_9 = arith.constant 0 : index
    %c0_10 = arith.constant 0 : index
    %5 = vector.load %arg6[%c0_9, %c0_10] : memref<32x48xf32, #tpu.memory_space<vmem>>, vector<32x48xf32>
    %c0_11 = arith.constant 0 : index
    %c0_12 = arith.constant 0 : index
    %6 = vector.load %arg7[%c0_11, %c0_12] : memref<16x48xf32, #tpu.memory_space<vmem>>, vector<16x48xf32>
    %c0_13 = arith.constant 0 : index
    %c0_14 = arith.constant 0 : index
    %7 = vector.load %arg8[%c0_13, %c0_14] : memref<1x48xf32, #tpu.memory_space<vmem>>, vector<1x48xf32>
    %c0_15 = arith.constant 0 : index
    %c0_16 = arith.constant 0 : index
    %8 = vector.load %arg9[%c0_15, %c0_16] : memref<1x48xf32, #tpu.memory_space<vmem>>, vector<1x48xf32>
    %c0_17 = arith.constant 0 : index
    %c0_18 = arith.constant 0 : index
    %9 = vector.load %arg10[%c0_17, %c0_18] : memref<32x48xf32, #tpu.memory_space<vmem>>, vector<32x48xf32>
    %c0_19 = arith.constant 0 : index
    %c0_20 = arith.constant 0 : index
    %10 = vector.load %arg11[%c0_19, %c0_20] : memref<16x48xf32, #tpu.memory_space<vmem>>, vector<16x48xf32>
    %c0_21 = arith.constant 0 : index
    %c0_22 = arith.constant 0 : index
    %11 = vector.load %arg12[%c0_21, %c0_22] : memref<1x48xf32, #tpu.memory_space<vmem>>, vector<1x48xf32>
    %c0_23 = arith.constant 0 : index
    %c0_24 = arith.constant 0 : index
    %12 = vector.load %arg13[%c0_23, %c0_24] : memref<1x48xf32, #tpu.memory_space<vmem>>, vector<1x48xf32>
    %c0_25 = arith.constant 0 : index
    %c0_26 = arith.constant 0 : index
    %13 = vector.load %arg14[%c0_25, %c0_26] : memref<32x48xf32, #tpu.memory_space<vmem>>, vector<32x48xf32>
    %c0_27 = arith.constant 0 : index
    %c0_28 = arith.constant 0 : index
    %14 = vector.load %arg15[%c0_27, %c0_28] : memref<16x48xf32, #tpu.memory_space<vmem>>, vector<16x48xf32>
    %c0_29 = arith.constant 0 : index
    %c0_30 = arith.constant 0 : index
    %15 = vector.load %arg16[%c0_29, %c0_30] : memref<1x48xf32, #tpu.memory_space<vmem>>, vector<1x48xf32>
    %c0_31 = arith.constant 0 : index
    %c0_32 = arith.constant 0 : index
    %16 = vector.load %arg17[%c0_31, %c0_32] : memref<1x48xf32, #tpu.memory_space<vmem>>, vector<1x48xf32>
    %17 = vector.extract_strided_slice %9 {offsets = [0, 0], sizes = [16, 48], strides = [1, 1]} : vector<32x48xf32> to vector<16x48xf32>
    %18 = vector.extract_strided_slice %9 {offsets = [16, 0], sizes = [16, 48], strides = [1, 1]} : vector<32x48xf32> to vector<16x48xf32>
    %19 = vector.extract_strided_slice %13 {offsets = [0, 0], sizes = [16, 48], strides = [1, 1]} : vector<32x48xf32> to vector<16x48xf32>
    %20 = vector.extract_strided_slice %13 {offsets = [16, 0], sizes = [16, 48], strides = [1, 1]} : vector<32x48xf32> to vector<16x48xf32>
    %cst = arith.constant 0.000000e+00 : f32
    %21 = vector.broadcast %cst : f32 to vector<2x16xf32>
    %c0_33 = arith.constant 0 : index
    %c0_34 = arith.constant 0 : index
    %22 = vector.load %arg21[%c0_33, %c0_34] : memref<2x16xf32, #tpu.memory_space<vmem>>, vector<2x16xf32>
    tpu.vector_store %arg21[%c0_33, %c0_34], %21 {strides = array<i32>} : memref<2x16xf32, #tpu.memory_space<vmem>>, vector<2x16xf32>,
    %c0_i32 = arith.constant 0 : i32
    %c8_i32 = arith.constant 8 : i32
    %23 = arith.addi %c0_i32, %c8_i32 : i32
    %c1_i32 = arith.constant 1 : i32
    scf.for %arg22 = %c0_i32 to %23 step %c1_i32  : i32 {
      %c1_i32_57 = arith.constant 1 : i32
      %33 = arith.muli %arg22, %c1_i32_57 : i32
      %c0_i32_58 = arith.constant 0 : i32
      %34 = arith.addi %c0_i32_58, %33 : i32
      %35 = vector.broadcast %34 : i32 to vector<2x1xi32>
      %36 = arith.cmpi slt, %35, %0 : vector<2x1xi32>
      %37 = arith.index_cast %34 : i32 to index
      %c0_59 = arith.constant 0 : index
      %c0_60 = arith.constant 0 : index
      %38 = vector.load %arg0[%37, %c0_59, %c0_60] : memref<8x2x32xf32, #tpu.memory_space<vmem>>, vector<1x2x32xf32>
      %39 = vector.shape_cast %38 : vector<1x2x32xf32> to vector<2x32xf32>
      %cst_61 = arith.constant dense<0.000000e+00> : vector<2x48xf32>
      %40 = tpu.matmul %39, %1, %cst_61 {dimension_numbers = #tpu.dot_dimension_numbers<[1], [0], [0], [1], [0, 0, 1, 1], [], []>} : vector<2x32xf32>, vector<32x48xf32>, vector<2x48xf32> -> vector<2x48xf32>
      %41 = vector.broadcast %3 : vector<1x48xf32> to vector<2x48xf32>
      %42 = arith.addf %40, %41 : vector<2x48xf32>
      %c0_62 = arith.constant 0 : index
      %c0_63 = arith.constant 0 : index
      %43 = vector.load %arg21[%c0_62, %c0_63] : memref<2x16xf32, #tpu.memory_space<vmem>>, vector<2x16xf32>
      %cst_64 = arith.constant dense<0.000000e+00> : vector<2x48xf32>
      %44 = tpu.matmul %43, %2, %cst_64 {dimension_numbers = #tpu.dot_dimension_numbers<[1], [0], [0], [1], [0, 0, 1, 1], [], []>} : vector<2x16xf32>, vector<16x48xf32>, vector<2x48xf32> -> vector<2x48xf32>
      %45 = vector.broadcast %4 : vector<1x48xf32> to vector<2x48xf32>
      %46 = arith.addf %44, %45 : vector<2x48xf32>
      %47 = vector.extract_strided_slice %42 {offsets = [0, 0], sizes = [2, 16], strides = [1, 1]} : vector<2x48xf32> to vector<2x16xf32>
      %48 = vector.extract_strided_slice %46 {offsets = [0, 0], sizes = [2, 16], strides = [1, 1]} : vector<2x48xf32> to vector<2x16xf32>
      %49 = arith.addf %47, %48 : vector<2x16xf32>
      %50 = arith.negf %49 : vector<2x16xf32>
      %51 = math.exp %50 : vector<2x16xf32>
      %cst_65 = arith.constant 1.000000e+00 : f32
      %52 = vector.broadcast %cst_65 : f32 to vector<2x16xf32>
      %53 = arith.addf %52, %51 : vector<2x16xf32>
      %54 = arith.divf %52, %53 : vector<2x16xf32>
      %55 = vector.extract_strided_slice %42 {offsets = [0, 16], sizes = [2, 16], strides = [1, 1]} : vector<2x48xf32> to vector<2x16xf32>
      %56 = vector.extract_strided_slice %46 {offsets = [0, 16], sizes = [2, 16], strides = [1, 1]} : vector<2x48xf32> to vector<2x16xf32>
      %57 = arith.addf %55, %56 : vector<2x16xf32>
      %58 = arith.negf %57 : vector<2x16xf32>
      %59 = math.exp %58 : vector<2x16xf32>
      %cst_66 = arith.constant 1.000000e+00 : f32
      %60 = vector.broadcast %cst_66 : f32 to vector<2x16xf32>
      %61 = arith.addf %60, %59 : vector<2x16xf32>
      %62 = arith.divf %60, %61 : vector<2x16xf32>
      %63 = vector.extract_strided_slice %42 {offsets = [0, 32], sizes = [2, 16], strides = [1, 1]} : vector<2x48xf32> to vector<2x16xf32>
      %64 = vector.extract_strided_slice %46 {offsets = [0, 32], sizes = [2, 16], strides = [1, 1]} : vector<2x48xf32> to vector<2x16xf32>
      %65 = arith.mulf %54, %64 : vector<2x16xf32>
      %66 = arith.addf %63, %65 : vector<2x16xf32>
      %67 = math.tanh %66 : vector<2x16xf32>
      %cst_67 = arith.constant 1.000000e+00 : f32
      %68 = vector.broadcast %cst_67 : f32 to vector<2x16xf32>
      %69 = arith.subf %68, %62 : vector<2x16xf32>
      %70 = arith.mulf %69, %67 : vector<2x16xf32>
      %71 = arith.mulf %62, %43 : vector<2x16xf32>
      %72 = arith.addf %70, %71 : vector<2x16xf32>
      %73 = vector.shape_cast %36 : vector<2x1xi1> to vector<2x1xi1>
      %74 = vector.broadcast %73 : vector<2x1xi1> to vector<2x16xi1>
      %75 = arith.select %74, %72, %43 : vector<2x16xi1>, vector<2x16xf32>
      %c0_68 = arith.constant 0 : index
      %c0_69 = arith.constant 0 : index
      %76 = vector.load %arg21[%c0_68, %c0_69] : memref<2x16xf32, #tpu.memory_space<vmem>>, vector<2x16xf32>
      tpu.vector_store %arg21[%c0_68, %c0_69], %75 {strides = array<i32>} : memref<2x16xf32, #tpu.memory_space<vmem>>, vector<2x16xf32>,
      %cst_70 = arith.constant 0.000000e+00 : f32
      %77 = vector.shape_cast %36 : vector<2x1xi1> to vector<2x1xi1>
      %78 = vector.broadcast %77 : vector<2x1xi1> to vector<2x16xi1>
      %79 = vector.broadcast %cst_70 : f32 to vector<2x16xf32>
      %80 = arith.select %78, %75, %79 : vector<2x16xi1>, vector<2x16xf32>
      %81 = arith.index_cast %34 : i32 to index
      %c0_71 = arith.constant 0 : index
      %c0_72 = arith.constant 0 : index
      %82 = vector.load %arg19[%81, %c0_71, %c0_72] : memref<8x2x16xf32, #tpu.memory_space<vmem>>, vector<1x2x16xf32>
      %83 = vector.shape_cast %82 : vector<1x2x16xf32> to vector<2x16xf32>
      %84 = vector.shape_cast %80 : vector<2x16xf32> to vector<1x2x16xf32>
      tpu.vector_store %arg19[%81, %c0_71, %c0_72], %84 {strides = array<i32>} : memref<8x2x16xf32, #tpu.memory_space<vmem>>, vector<1x2x16xf32>,
    }
    %c8_i32_35 = arith.constant 8 : i32
    %cst_36 = arith.constant 0.000000e+00 : f32
    %24 = vector.broadcast %cst_36 : f32 to vector<2x16xf32>
    %c0_37 = arith.constant 0 : index
    %c0_38 = arith.constant 0 : index
    %25 = vector.load %arg21[%c0_37, %c0_38] : memref<2x16xf32, #tpu.memory_space<vmem>>, vector<2x16xf32>
    tpu.vector_store %arg21[%c0_37, %c0_38], %24 {strides = array<i32>} : memref<2x16xf32, #tpu.memory_space<vmem>>, vector<2x16xf32>,
    %c0_i32_39 = arith.constant 0 : i32
    %c8_i32_40 = arith.constant 8 : i32
    %26 = arith.addi %c0_i32_39, %c8_i32_40 : i32
    %c1_i32_41 = arith.constant 1 : i32
    scf.for %arg22 = %c0_i32_39 to %26 step %c1_i32_41  : i32 {
      %c1_i32_57 = arith.constant 1 : i32
      %33 = arith.muli %arg22, %c1_i32_57 : i32
      %c0_i32_58 = arith.constant 0 : i32
      %34 = arith.addi %c0_i32_58, %33 : i32
      %c7_i32 = arith.constant 7 : i32
      %35 = arith.subi %c7_i32, %34 : i32
      %36 = vector.broadcast %35 : i32 to vector<2x1xi32>
      %37 = arith.cmpi slt, %36, %0 : vector<2x1xi32>
      %38 = arith.index_cast %35 : i32 to index
      %c0_59 = arith.constant 0 : index
      %c0_60 = arith.constant 0 : index
      %39 = vector.load %arg0[%38, %c0_59, %c0_60] : memref<8x2x32xf32, #tpu.memory_space<vmem>>, vector<1x2x32xf32>
      %40 = vector.shape_cast %39 : vector<1x2x32xf32> to vector<2x32xf32>
      %cst_61 = arith.constant dense<0.000000e+00> : vector<2x48xf32>
      %41 = tpu.matmul %40, %5, %cst_61 {dimension_numbers = #tpu.dot_dimension_numbers<[1], [0], [0], [1], [0, 0, 1, 1], [], []>} : vector<2x32xf32>, vector<32x48xf32>, vector<2x48xf32> -> vector<2x48xf32>
      %42 = vector.broadcast %7 : vector<1x48xf32> to vector<2x48xf32>
      %43 = arith.addf %41, %42 : vector<2x48xf32>
      %c0_62 = arith.constant 0 : index
      %c0_63 = arith.constant 0 : index
      %44 = vector.load %arg21[%c0_62, %c0_63] : memref<2x16xf32, #tpu.memory_space<vmem>>, vector<2x16xf32>
      %cst_64 = arith.constant dense<0.000000e+00> : vector<2x48xf32>
      %45 = tpu.matmul %44, %6, %cst_64 {dimension_numbers = #tpu.dot_dimension_numbers<[1], [0], [0], [1], [0, 0, 1, 1], [], []>} : vector<2x16xf32>, vector<16x48xf32>, vector<2x48xf32> -> vector<2x48xf32>
      %46 = vector.broadcast %8 : vector<1x48xf32> to vector<2x48xf32>
      %47 = arith.addf %45, %46 : vector<2x48xf32>
      %48 = vector.extract_strided_slice %43 {offsets = [0, 0], sizes = [2, 16], strides = [1, 1]} : vector<2x48xf32> to vector<2x16xf32>
      %49 = vector.extract_strided_slice %47 {offsets = [0, 0], sizes = [2, 16], strides = [1, 1]} : vector<2x48xf32> to vector<2x16xf32>
      %50 = arith.addf %48, %49 : vector<2x16xf32>
      %51 = arith.negf %50 : vector<2x16xf32>
      %52 = math.exp %51 : vector<2x16xf32>
      %cst_65 = arith.constant 1.000000e+00 : f32
      %53 = vector.broadcast %cst_65 : f32 to vector<2x16xf32>
      %54 = arith.addf %53, %52 : vector<2x16xf32>
      %55 = arith.divf %53, %54 : vector<2x16xf32>
      %56 = vector.extract_strided_slice %43 {offsets = [0, 16], sizes = [2, 16], strides = [1, 1]} : vector<2x48xf32> to vector<2x16xf32>
      %57 = vector.extract_strided_slice %47 {offsets = [0, 16], sizes = [2, 16], strides = [1, 1]} : vector<2x48xf32> to vector<2x16xf32>
      %58 = arith.addf %56, %57 : vector<2x16xf32>
      %59 = arith.negf %58 : vector<2x16xf32>
      %60 = math.exp %59 : vector<2x16xf32>
      %cst_66 = arith.constant 1.000000e+00 : f32
      %61 = vector.broadcast %cst_66 : f32 to vector<2x16xf32>
      %62 = arith.addf %61, %60 : vector<2x16xf32>
      %63 = arith.divf %61, %62 : vector<2x16xf32>
      %64 = vector.extract_strided_slice %43 {offsets = [0, 32], sizes = [2, 16], strides = [1, 1]} : vector<2x48xf32> to vector<2x16xf32>
      %65 = vector.extract_strided_slice %47 {offsets = [0, 32], sizes = [2, 16], strides = [1, 1]} : vector<2x48xf32> to vector<2x16xf32>
      %66 = arith.mulf %55, %65 : vector<2x16xf32>
      %67 = arith.addf %64, %66 : vector<2x16xf32>
      %68 = math.tanh %67 : vector<2x16xf32>
      %cst_67 = arith.constant 1.000000e+00 : f32
      %69 = vector.broadcast %cst_67 : f32 to vector<2x16xf32>
      %70 = arith.subf %69, %63 : vector<2x16xf32>
      %71 = arith.mulf %70, %68 : vector<2x16xf32>
      %72 = arith.mulf %63, %44 : vector<2x16xf32>
      %73 = arith.addf %71, %72 : vector<2x16xf32>
      %74 = vector.shape_cast %37 : vector<2x1xi1> to vector<2x1xi1>
      %75 = vector.broadcast %74 : vector<2x1xi1> to vector<2x16xi1>
      %76 = arith.select %75, %73, %44 : vector<2x16xi1>, vector<2x16xf32>
      %c0_68 = arith.constant 0 : index
      %c0_69 = arith.constant 0 : index
      %77 = vector.load %arg21[%c0_68, %c0_69] : memref<2x16xf32, #tpu.memory_space<vmem>>, vector<2x16xf32>
      tpu.vector_store %arg21[%c0_68, %c0_69], %76 {strides = array<i32>} : memref<2x16xf32, #tpu.memory_space<vmem>>, vector<2x16xf32>,
      %cst_70 = arith.constant 0.000000e+00 : f32
      %78 = vector.shape_cast %37 : vector<2x1xi1> to vector<2x1xi1>
      %79 = vector.broadcast %78 : vector<2x1xi1> to vector<2x16xi1>
      %80 = vector.broadcast %cst_70 : f32 to vector<2x16xf32>
      %81 = arith.select %79, %76, %80 : vector<2x16xi1>, vector<2x16xf32>
      %82 = arith.index_cast %35 : i32 to index
      %c0_71 = arith.constant 0 : index
      %c0_72 = arith.constant 0 : index
      %83 = vector.load %arg20[%82, %c0_71, %c0_72] : memref<8x2x16xf32, #tpu.memory_space<vmem>>, vector<1x2x16xf32>
      %84 = vector.shape_cast %83 : vector<1x2x16xf32> to vector<2x16xf32>
      %85 = vector.shape_cast %81 : vector<2x16xf32> to vector<1x2x16xf32>
      tpu.vector_store %arg20[%82, %c0_71, %c0_72], %85 {strides = array<i32>} : memref<8x2x16xf32, #tpu.memory_space<vmem>>, vector<1x2x16xf32>,
    }
    %c8_i32_42 = arith.constant 8 : i32
    %cst_43 = arith.constant 0.000000e+00 : f32
    %27 = vector.broadcast %cst_43 : f32 to vector<2x16xf32>
    %c0_44 = arith.constant 0 : index
    %c0_45 = arith.constant 0 : index
    %28 = vector.load %arg21[%c0_44, %c0_45] : memref<2x16xf32, #tpu.memory_space<vmem>>, vector<2x16xf32>
    tpu.vector_store %arg21[%c0_44, %c0_45], %27 {strides = array<i32>} : memref<2x16xf32, #tpu.memory_space<vmem>>, vector<2x16xf32>,
    %c0_i32_46 = arith.constant 0 : i32
    %c8_i32_47 = arith.constant 8 : i32
    %29 = arith.addi %c0_i32_46, %c8_i32_47 : i32
    %c1_i32_48 = arith.constant 1 : i32
    scf.for %arg22 = %c0_i32_46 to %29 step %c1_i32_48  : i32 {
      %c1_i32_57 = arith.constant 1 : i32
      %33 = arith.muli %arg22, %c1_i32_57 : i32
      %c0_i32_58 = arith.constant 0 : i32
      %34 = arith.addi %c0_i32_58, %33 : i32
      %35 = vector.broadcast %34 : i32 to vector<2x1xi32>
      %36 = arith.cmpi slt, %35, %0 : vector<2x1xi32>
      %37 = arith.index_cast %34 : i32 to index
      %c0_59 = arith.constant 0 : index
      %c0_60 = arith.constant 0 : index
      %38 = vector.load %arg19[%37, %c0_59, %c0_60] : memref<8x2x16xf32, #tpu.memory_space<vmem>>, vector<1x2x16xf32>
      %39 = vector.shape_cast %38 : vector<1x2x16xf32> to vector<2x16xf32>
      %cst_61 = arith.constant dense<0.000000e+00> : vector<2x48xf32>
      %40 = tpu.matmul %39, %17, %cst_61 {dimension_numbers = #tpu.dot_dimension_numbers<[1], [0], [0], [1], [0, 0, 1, 1], [], []>} : vector<2x16xf32>, vector<16x48xf32>, vector<2x48xf32> -> vector<2x48xf32>
      %41 = arith.index_cast %34 : i32 to index
      %c0_62 = arith.constant 0 : index
      %c0_63 = arith.constant 0 : index
      %42 = vector.load %arg20[%41, %c0_62, %c0_63] : memref<8x2x16xf32, #tpu.memory_space<vmem>>, vector<1x2x16xf32>
      %43 = vector.shape_cast %42 : vector<1x2x16xf32> to vector<2x16xf32>
      %cst_64 = arith.constant dense<0.000000e+00> : vector<2x48xf32>
      %44 = tpu.matmul %43, %18, %cst_64 {dimension_numbers = #tpu.dot_dimension_numbers<[1], [0], [0], [1], [0, 0, 1, 1], [], []>} : vector<2x16xf32>, vector<16x48xf32>, vector<2x48xf32> -> vector<2x48xf32>
      %45 = arith.addf %40, %44 : vector<2x48xf32>
      %46 = vector.broadcast %11 : vector<1x48xf32> to vector<2x48xf32>
      %47 = arith.addf %45, %46 : vector<2x48xf32>
      %c0_65 = arith.constant 0 : index
      %c0_66 = arith.constant 0 : index
      %48 = vector.load %arg21[%c0_65, %c0_66] : memref<2x16xf32, #tpu.memory_space<vmem>>, vector<2x16xf32>
      %cst_67 = arith.constant dense<0.000000e+00> : vector<2x48xf32>
      %49 = tpu.matmul %48, %10, %cst_67 {dimension_numbers = #tpu.dot_dimension_numbers<[1], [0], [0], [1], [0, 0, 1, 1], [], []>} : vector<2x16xf32>, vector<16x48xf32>, vector<2x48xf32> -> vector<2x48xf32>
      %50 = vector.broadcast %12 : vector<1x48xf32> to vector<2x48xf32>
      %51 = arith.addf %49, %50 : vector<2x48xf32>
      %52 = vector.extract_strided_slice %47 {offsets = [0, 0], sizes = [2, 16], strides = [1, 1]} : vector<2x48xf32> to vector<2x16xf32>
      %53 = vector.extract_strided_slice %51 {offsets = [0, 0], sizes = [2, 16], strides = [1, 1]} : vector<2x48xf32> to vector<2x16xf32>
      %54 = arith.addf %52, %53 : vector<2x16xf32>
      %55 = arith.negf %54 : vector<2x16xf32>
      %56 = math.exp %55 : vector<2x16xf32>
      %cst_68 = arith.constant 1.000000e+00 : f32
      %57 = vector.broadcast %cst_68 : f32 to vector<2x16xf32>
      %58 = arith.addf %57, %56 : vector<2x16xf32>
      %59 = arith.divf %57, %58 : vector<2x16xf32>
      %60 = vector.extract_strided_slice %47 {offsets = [0, 16], sizes = [2, 16], strides = [1, 1]} : vector<2x48xf32> to vector<2x16xf32>
      %61 = vector.extract_strided_slice %51 {offsets = [0, 16], sizes = [2, 16], strides = [1, 1]} : vector<2x48xf32> to vector<2x16xf32>
      %62 = arith.addf %60, %61 : vector<2x16xf32>
      %63 = arith.negf %62 : vector<2x16xf32>
      %64 = math.exp %63 : vector<2x16xf32>
      %cst_69 = arith.constant 1.000000e+00 : f32
      %65 = vector.broadcast %cst_69 : f32 to vector<2x16xf32>
      %66 = arith.addf %65, %64 : vector<2x16xf32>
      %67 = arith.divf %65, %66 : vector<2x16xf32>
      %68 = vector.extract_strided_slice %47 {offsets = [0, 32], sizes = [2, 16], strides = [1, 1]} : vector<2x48xf32> to vector<2x16xf32>
      %69 = vector.extract_strided_slice %51 {offsets = [0, 32], sizes = [2, 16], strides = [1, 1]} : vector<2x48xf32> to vector<2x16xf32>
      %70 = arith.mulf %59, %69 : vector<2x16xf32>
      %71 = arith.addf %68, %70 : vector<2x16xf32>
      %72 = math.tanh %71 : vector<2x16xf32>
      %cst_70 = arith.constant 1.000000e+00 : f32
      %73 = vector.broadcast %cst_70 : f32 to vector<2x16xf32>
      %74 = arith.subf %73, %67 : vector<2x16xf32>
      %75 = arith.mulf %74, %72 : vector<2x16xf32>
      %76 = arith.mulf %67, %48 : vector<2x16xf32>
      %77 = arith.addf %75, %76 : vector<2x16xf32>
      %78 = vector.shape_cast %36 : vector<2x1xi1> to vector<2x1xi1>
      %79 = vector.broadcast %78 : vector<2x1xi1> to vector<2x16xi1>
      %80 = arith.select %79, %77, %48 : vector<2x16xi1>, vector<2x16xf32>
      %c0_71 = arith.constant 0 : index
      %c0_72 = arith.constant 0 : index
      %81 = vector.load %arg21[%c0_71, %c0_72] : memref<2x16xf32, #tpu.memory_space<vmem>>, vector<2x16xf32>
      tpu.vector_store %arg21[%c0_71, %c0_72], %80 {strides = array<i32>} : memref<2x16xf32, #tpu.memory_space<vmem>>, vector<2x16xf32>,
      %cst_73 = arith.constant 0.000000e+00 : f32
      %82 = vector.shape_cast %36 : vector<2x1xi1> to vector<2x1xi1>
      %83 = vector.broadcast %82 : vector<2x1xi1> to vector<2x16xi1>
      %84 = vector.broadcast %cst_73 : f32 to vector<2x16xf32>
      %85 = arith.select %83, %80, %84 : vector<2x16xi1>, vector<2x16xf32>
      %86 = arith.index_cast %34 : i32 to index
      %c0_74 = arith.constant 0 : index
      %c0_75 = arith.constant 0 : index
      %87 = vector.load %arg18[%86, %c0_74, %c0_75] : memref<8x2x16xf32, #tpu.memory_space<vmem>>, vector<1x2x16xf32>
      %88 = vector.shape_cast %87 : vector<1x2x16xf32> to vector<2x16xf32>
      %89 = vector.shape_cast %85 : vector<2x16xf32> to vector<1x2x16xf32>
      tpu.vector_store %arg18[%86, %c0_74, %c0_75], %89 {strides = array<i32>} : memref<8x2x16xf32, #tpu.memory_space<vmem>>, vector<1x2x16xf32>,
    }
    %c8_i32_49 = arith.constant 8 : i32
    %cst_50 = arith.constant 0.000000e+00 : f32
    %30 = vector.broadcast %cst_50 : f32 to vector<2x16xf32>
    %c0_51 = arith.constant 0 : index
    %c0_52 = arith.constant 0 : index
    %31 = vector.load %arg21[%c0_51, %c0_52] : memref<2x16xf32, #tpu.memory_space<vmem>>, vector<2x16xf32>
    tpu.vector_store %arg21[%c0_51, %c0_52], %30 {strides = array<i32>} : memref<2x16xf32, #tpu.memory_space<vmem>>, vector<2x16xf32>,
    %c0_i32_53 = arith.constant 0 : i32
    %c8_i32_54 = arith.constant 8 : i32
    %32 = arith.addi %c0_i32_53, %c8_i32_54 : i32
    %c1_i32_55 = arith.constant 1 : i32
    scf.for %arg22 = %c0_i32_53 to %32 step %c1_i32_55  : i32 {
      %c1_i32_57 = arith.constant 1 : i32
      %33 = arith.muli %arg22, %c1_i32_57 : i32
      %c0_i32_58 = arith.constant 0 : i32
      %34 = arith.addi %c0_i32_58, %33 : i32
      %c7_i32 = arith.constant 7 : i32
      %35 = arith.subi %c7_i32, %34 : i32
      %36 = vector.broadcast %35 : i32 to vector<2x1xi32>
      %37 = arith.cmpi slt, %36, %0 : vector<2x1xi32>
      %38 = arith.index_cast %35 : i32 to index
      %c0_59 = arith.constant 0 : index
      %c0_60 = arith.constant 0 : index
      %39 = vector.load %arg19[%38, %c0_59, %c0_60] : memref<8x2x16xf32, #tpu.memory_space<vmem>>, vector<1x2x16xf32>
      %40 = vector.shape_cast %39 : vector<1x2x16xf32> to vector<2x16xf32>
      %cst_61 = arith.constant dense<0.000000e+00> : vector<2x48xf32>
      %41 = tpu.matmul %40, %19, %cst_61 {dimension_numbers = #tpu.dot_dimension_numbers<[1], [0], [0], [1], [0, 0, 1, 1], [], []>} : vector<2x16xf32>, vector<16x48xf32>, vector<2x48xf32> -> vector<2x48xf32>
      %42 = arith.index_cast %35 : i32 to index
      %c0_62 = arith.constant 0 : index
      %c0_63 = arith.constant 0 : index
      %43 = vector.load %arg20[%42, %c0_62, %c0_63] : memref<8x2x16xf32, #tpu.memory_space<vmem>>, vector<1x2x16xf32>
      %44 = vector.shape_cast %43 : vector<1x2x16xf32> to vector<2x16xf32>
      %cst_64 = arith.constant dense<0.000000e+00> : vector<2x48xf32>
      %45 = tpu.matmul %44, %20, %cst_64 {dimension_numbers = #tpu.dot_dimension_numbers<[1], [0], [0], [1], [0, 0, 1, 1], [], []>} : vector<2x16xf32>, vector<16x48xf32>, vector<2x48xf32> -> vector<2x48xf32>
      %46 = arith.addf %41, %45 : vector<2x48xf32>
      %47 = vector.broadcast %15 : vector<1x48xf32> to vector<2x48xf32>
      %48 = arith.addf %46, %47 : vector<2x48xf32>
      %c0_65 = arith.constant 0 : index
      %c0_66 = arith.constant 0 : index
      %49 = vector.load %arg21[%c0_65, %c0_66] : memref<2x16xf32, #tpu.memory_space<vmem>>, vector<2x16xf32>
      %cst_67 = arith.constant dense<0.000000e+00> : vector<2x48xf32>
      %50 = tpu.matmul %49, %14, %cst_67 {dimension_numbers = #tpu.dot_dimension_numbers<[1], [0], [0], [1], [0, 0, 1, 1], [], []>} : vector<2x16xf32>, vector<16x48xf32>, vector<2x48xf32> -> vector<2x48xf32>
      %51 = vector.broadcast %16 : vector<1x48xf32> to vector<2x48xf32>
      %52 = arith.addf %50, %51 : vector<2x48xf32>
      %53 = vector.extract_strided_slice %48 {offsets = [0, 0], sizes = [2, 16], strides = [1, 1]} : vector<2x48xf32> to vector<2x16xf32>
      %54 = vector.extract_strided_slice %52 {offsets = [0, 0], sizes = [2, 16], strides = [1, 1]} : vector<2x48xf32> to vector<2x16xf32>
      %55 = arith.addf %53, %54 : vector<2x16xf32>
      %56 = arith.negf %55 : vector<2x16xf32>
      %57 = math.exp %56 : vector<2x16xf32>
      %cst_68 = arith.constant 1.000000e+00 : f32
      %58 = vector.broadcast %cst_68 : f32 to vector<2x16xf32>
      %59 = arith.addf %58, %57 : vector<2x16xf32>
      %60 = arith.divf %58, %59 : vector<2x16xf32>
      %61 = vector.extract_strided_slice %48 {offsets = [0, 16], sizes = [2, 16], strides = [1, 1]} : vector<2x48xf32> to vector<2x16xf32>
      %62 = vector.extract_strided_slice %52 {offsets = [0, 16], sizes = [2, 16], strides = [1, 1]} : vector<2x48xf32> to vector<2x16xf32>
      %63 = arith.addf %61, %62 : vector<2x16xf32>
      %64 = arith.negf %63 : vector<2x16xf32>
      %65 = math.exp %64 : vector<2x16xf32>
      %cst_69 = arith.constant 1.000000e+00 : f32
      %66 = vector.broadcast %cst_69 : f32 to vector<2x16xf32>
      %67 = arith.addf %66, %65 : vector<2x16xf32>
      %68 = arith.divf %66, %67 : vector<2x16xf32>
      %69 = vector.extract_strided_slice %48 {offsets = [0, 32], sizes = [2, 16], strides = [1, 1]} : vector<2x48xf32> to vector<2x16xf32>
      %70 = vector.extract_strided_slice %52 {offsets = [0, 32], sizes = [2, 16], strides = [1, 1]} : vector<2x48xf32> to vector<2x16xf32>
      %71 = arith.mulf %60, %70 : vector<2x16xf32>
      %72 = arith.addf %69, %71 : vector<2x16xf32>
      %73 = math.tanh %72 : vector<2x16xf32>
      %cst_70 = arith.constant 1.000000e+00 : f32
      %74 = vector.broadcast %cst_70 : f32 to vector<2x16xf32>
      %75 = arith.subf %74, %68 : vector<2x16xf32>
      %76 = arith.mulf %75, %73 : vector<2x16xf32>
      %77 = arith.mulf %68, %49 : vector<2x16xf32>
      %78 = arith.addf %76, %77 : vector<2x16xf32>
      %79 = vector.shape_cast %37 : vector<2x1xi1> to vector<2x1xi1>
      %80 = vector.broadcast %79 : vector<2x1xi1> to vector<2x16xi1>
      %81 = arith.select %80, %78, %49 : vector<2x16xi1>, vector<2x16xf32>
      %c0_71 = arith.constant 0 : index
      %c0_72 = arith.constant 0 : index
      %82 = vector.load %arg21[%c0_71, %c0_72] : memref<2x16xf32, #tpu.memory_space<vmem>>, vector<2x16xf32>
      tpu.vector_store %arg21[%c0_71, %c0_72], %81 {strides = array<i32>} : memref<2x16xf32, #tpu.memory_space<vmem>>, vector<2x16xf32>,
      %83 = arith.index_cast %35 : i32 to index
      %c0_73 = arith.constant 0 : index
      %c0_74 = arith.constant 0 : index
      %84 = vector.load %arg18[%83, %c0_73, %c0_74] : memref<8x2x16xf32, #tpu.memory_space<vmem>>, vector<1x2x16xf32>
      %85 = vector.shape_cast %84 : vector<1x2x16xf32> to vector<2x16xf32>
      %cst_75 = arith.constant 0.000000e+00 : f32
      %86 = vector.shape_cast %37 : vector<2x1xi1> to vector<2x1xi1>
      %87 = vector.broadcast %86 : vector<2x1xi1> to vector<2x16xi1>
      %88 = vector.broadcast %cst_75 : f32 to vector<2x16xf32>
      %89 = arith.select %87, %81, %88 : vector<2x16xi1>, vector<2x16xf32>
      %90 = arith.addf %85, %89 : vector<2x16xf32>
      %91 = arith.index_cast %35 : i32 to index
      %c0_76 = arith.constant 0 : index
      %c0_77 = arith.constant 0 : index
      %92 = vector.load %arg18[%91, %c0_76, %c0_77] : memref<8x2x16xf32, #tpu.memory_space<vmem>>, vector<1x2x16xf32>
      %93 = vector.shape_cast %92 : vector<1x2x16xf32> to vector<2x16xf32>
      %94 = vector.shape_cast %90 : vector<2x16xf32> to vector<1x2x16xf32>
      tpu.vector_store %arg18[%91, %c0_76, %c0_77], %94 {strides = array<i32>} : memref<8x2x16xf32, #tpu.memory_space<vmem>>, vector<1x2x16xf32>,
    }
    %c8_i32_56 = arith.constant 8 : i32
    return
  }
}

</mosaic_0001>

<bundles_post_ra>
// kernel: tpu_custom_call.1
= control target key start
LH: loop header
LB: loop body
LE: loop exit
PB: predicated region body
PF: predicated region fallthrough
CT: control target
= control target key end

     0   :  { %s1831_s0 = inlined_call_operand.hbm [shape: f32[8,2,32], index: 0, kind: input, shape index: {}]   ;;  %s1832_s1 = inlined_call_operand.vmem [shape: s32[2,1], index: 1, kind: input, shape index: {}]   ;;  %s1833_s2 = inlined_call_operand.hbm [shape: f32[32,48], index: 2, kind: input, shape index: {}]   ;;  %s1834_s3 = inlined_call_operand.hbm [shape: f32[16,48], index: 3, kind: input, shape index: {}]   ;;  %s1835_s4 = inlined_call_operand.vmem [shape: f32[1,48], index: 4, kind: input, shape index: {}]   ;;  %s1836_s5 = inlined_call_operand.hbm [shape: f32[1,48], index: 5, kind: input, shape index: {}]   ;;  %s1837_s6 = inlined_call_operand.hbm [shape: f32[32,48], index: 6, kind: input, shape index: {}]   ;;  %s1838_s7 = inlined_call_operand.hbm [shape: f32[16,48], index: 7, kind: input, shape index: {}]   ;;  %s1839_s8 = inlined_call_operand.hbm [shape: f32[1,48], index: 8, kind: input, shape index: {}]   ;;  %s1840_s9 = inlined_call_operand.hbm [shape: f32[1,48], index: 9, kind: input, shape index: {}]   ;;  %s1841_s10 = inlined_call_operand.hbm [shape: f32[32,48], index: 10, kind: input, shape index: {}]   ;;  %s1842_s11 = inlined_call_operand.hbm [shape: f32[16,48], index: 11, kind: input, shape index: {}]   ;;  %s1843_s12 = inlined_call_operand.hbm [shape: f32[1,48], index: 12, kind: input, shape index: {}]   ;;  %s1844_s13 = inlined_call_operand.hbm [shape: f32[1,48], index: 13, kind: input, shape index: {}]   ;;  %s1845_s14 = inlined_call_operand.hbm [shape: f32[32,48], index: 14, kind: input, shape index: {}]   ;;  %s1846_s15 = inlined_call_operand.vmem [shape: f32[16,48], index: 15, kind: input, shape index: {}]   ;;  %s1847_s16 = inlined_call_operand.vmem [shape: f32[1,48], index: 16, kind: input, shape index: {}]   ;;  %s1848_s17 = inlined_call_operand.vmem [shape: f32[1,48], index: 17, kind: input, shape index: {}]   ;;  %s1849_s18 = inlined_call_operand.hbm [shape: f32[8,2,16], index: 18, kind: output, shape index: {}]  }
   0x1   :  { %1850 = sst [smem:[#allocation35_spill]] %s1831_s0 }
   0x2   :  { %1851 = sst [smem:[#allocation36_spill]] %s1832_s1 }
   0x3   :  { %1852 = sst [smem:[#allocation37_spill]] %s1833_s2 }
   0x4   :  { %23 = vsyncpa [#allocation6], 0 }
   0x5   :  { %24 = vsyncpa [#allocation9], 0 }
   0x6   :  { %25 = vsyncpa [#allocation12], 0 }
   0x7   :  { %26 = vsyncpa [#allocation15], 0 }
   0x8   :  { %27 = vsyncpa [#allocation18], 0 }
   0x9   :  { %28 = vsyncpa [#allocation21], 0 }
   0xa   :  { %29 = vsyncpa [#allocation24], 0  ;;  %s1853_s29 = sld [smem:[#allocation37_spill]] }
  0x10   :  { %s50_s30 = sshll.u32 %s1853_s29, 4  ;;  %s51_s30 = int_to_ptr.hbm [resolvable:$true] %s50_s30 }
  0x11   :  { %30 = vsyncpa [#allocation7], 0  ;;  %s1418_s0 = smov [#allocation8]   ;;  %s79_s21 = sshll.u32 %s1836_s5, 4  ;;  %s80_s21 = int_to_ptr.hbm [resolvable:$true] %s79_s21 }
  0x12   :  { %s52_s19 = sshll.u32 %s1418_s0, 4  ;;  %s1419_s22 = smov 128   ;;  %s53_s19 = int_to_ptr.vmem [resolvable:$true] %s52_s19 }
  0x13   :  { %s1420_s2 = smov 8   ;;  %s1421_s23 = smov [#allocation11]  }
  0x14   :  { %58 = dma.hbm_to_vmem [thread:$0]  %s51_s30, 512, %s53_s19, [#allocation9], %s1419_s22, %s1419_s22, %s1420_s2  }
  0x15   :  { %s81_s24 = sshll.u32 %s1421_s23, 4  ;;  %s102_s27 = sshll.u32 %s1838_s7, 4  ;;  %s82_s24 = int_to_ptr.vmem [resolvable:$true] %s81_s24  ;;  %s103_s27 = int_to_ptr.hbm [resolvable:$true] %s102_s27 }
  0x16   :  { %84 = dma.hbm_to_vmem [thread:$0]  %s80_s21, 16, %s82_s24, [#allocation12]  }
  0x17   :  { %s127_s5 = sshll.u32 %s1840_s9, 4  ;;  %s1422_s0 = smov [#allocation14]   ;;  %s128_s5 = int_to_ptr.hbm [resolvable:$true] %s127_s5 }
  0x18   :  { %s104_s1 = sshll.u32 %s1422_s0, 4  ;;  %s1423_s30 = smov [#allocation17]   ;;  %s105_s1 = int_to_ptr.vmem [resolvable:$true] %s104_s1 }
  0x19   :  { %110 = dma.hbm_to_vmem [thread:$0]  %s103_s27, 256, %s105_s1, [#allocation15], %s1419_s22, %s1419_s22, %s1420_s2  }
  0x1a   :  { %s129_s19 = sshll.u32 %s1423_s30, 4  ;;  %s150_s7 = sshll.u32 %s1842_s11, 4  ;;  %s130_s19 = int_to_ptr.vmem [resolvable:$true] %s129_s19  ;;  %s151_s7 = int_to_ptr.hbm [resolvable:$true] %s150_s7 }
  0x1b   :  { %132 = dma.hbm_to_vmem [thread:$0]  %s128_s5, 16, %s130_s19, [#allocation18]  }
  0x1c   :  { %s175_s9 = sshll.u32 %s1844_s13, 4  ;;  %s1424_s25 = smov [#allocation20]   ;;  %s176_s9 = int_to_ptr.hbm [resolvable:$true] %s175_s9 }
  0x1d   :  { %s152_s26 = sshll.u32 %s1424_s25, 4  ;;  %s1425_s27 = smov [#allocation23]   ;;  %s153_s26 = int_to_ptr.vmem [resolvable:$true] %s152_s26 }
  0x1e   :  { %158 = dma.hbm_to_vmem [thread:$0]  %s151_s7, 256, %s153_s26, [#allocation21], %s1419_s22, %s1419_s22, %s1420_s2  }
  0x1f   :  { %s177_s28 = sshll.u32 %s1425_s27, 4  ;;  %s1854_s11 = sld [smem:[#allocation35_spill]]  ;;  %s178_s28 = int_to_ptr.vmem [resolvable:$true] %s177_s28 }
  0x20   :  { %180 = dma.hbm_to_vmem [thread:$0]  %s176_s9, 16, %s178_s28, [#allocation24]  }
  0x21   :  { %s1426_s5 = smov [#allocation5]   ;;  %s63_s20 = sshll.u32 %s1834_s3, 4  ;;  %s64_s20 = int_to_ptr.hbm [resolvable:$true] %s63_s20 }
  0x22   :  { %s37_s30 = sshll.u32 %s1426_s5, 4  ;;  %s1427_s23 = smov 32   ;;  %s38_s30 = int_to_ptr.vmem [resolvable:$true] %s37_s30 }
  0x23   :  { %s1428_s21 = smov 2   ;;  %s1429_s7 = smov [#allocation10]  }
  0x24   :  { %s65_s24 = sshll.u32 %s1429_s7, 4  ;;  %s89_s9 = sshll.u32 %s1837_s6, 4  ;;  %s66_s24 = int_to_ptr.vmem [resolvable:$true] %s65_s24  ;;  %s90_s9 = int_to_ptr.hbm [resolvable:$true] %s89_s9 }
  0x25   :  { %s35_s1 = sshll.u32 %s1854_s11, 4  ;;  %s116_s28 = sshll.u32 %s1839_s8, 4  ;;  %s36_s1 = int_to_ptr.hbm [resolvable:$true] %s35_s1  ;;  %s117_s28 = int_to_ptr.hbm [resolvable:$true] %s116_s28 }
  0x26   :  { %43 = dma.hbm_to_vmem [thread:$0]  %s36_s1, 256, %s38_s30, [#allocation6], %s1427_s23, %s1427_s23, %s1428_s21  }
  0x27   :  { %71 = dma.hbm_to_vmem [thread:$0]  %s64_s20, 256, %s66_s24, [#allocation9], %s1419_s22, %s1419_s22, %s1420_s2  }
  0x28   :  { %s1430_s29 = smov [#allocation13]   ;;  %s1431_s11 = smov [#allocation16]  }
  0x29   :  { %s91_s0 = sshll.u32 %s1430_s29, 4  ;;  %s118_s6 = sshll.u32 %s1431_s11, 4  ;;  %s92_s0 = int_to_ptr.vmem [resolvable:$true] %s91_s0  ;;  %s119_s6 = int_to_ptr.vmem [resolvable:$true] %s118_s6 }
  0x2a   :  { %97 = dma.hbm_to_vmem [thread:$0]  %s90_s9, 512, %s92_s0, [#allocation12], %s1419_s22, %s1419_s22, %s1420_s2  }
  0x2b   :  { %s137_s30 = sshll.u32 %s1841_s10, 4  ;;  %s164_s8 = sshll.u32 %s1843_s12, 4  ;;  %s138_s30 = int_to_ptr.hbm [resolvable:$true] %s137_s30  ;;  %s165_s8 = int_to_ptr.hbm [resolvable:$true] %s164_s8 }
  0x2c   :  { %121 = dma.hbm_to_vmem [thread:$0]  %s117_s28, 16, %s119_s6, [#allocation15]  }
  0x2d   :  { %s1432_s20 = smov [#allocation19]   ;;  %s1433_s24 = smov [#allocation22]  }
  0x2e   :  { %s139_s7 = sshll.u32 %s1432_s20, 4  ;;  %s166_s25 = sshll.u32 %s1433_s24, 4  ;;  %s140_s7 = int_to_ptr.vmem [resolvable:$true] %s139_s7  ;;  %s167_s25 = int_to_ptr.vmem [resolvable:$true] %s166_s25 }
  0x2f   :  { %145 = dma.hbm_to_vmem [thread:$0]  %s138_s30, 512, %s140_s7, [#allocation18], %s1419_s22, %s1419_s22, %s1420_s2  }
  0x30   :  { %s185_s10 = sshll.u32 %s1845_s14, 4  ;;  %s1434_s3 = smov [#allocation25]   ;;  %s186_s10 = int_to_ptr.hbm [resolvable:$true] %s185_s10 }
  0x31   :  { %169 = dma.hbm_to_vmem [thread:$0]  %s165_s8, 16, %s167_s25, [#allocation21]  }
  0x32   :  { %s187_s27 = sshll.u32 %s1434_s3, 4  ;;  %s188_s27 = int_to_ptr.vmem [resolvable:$true] %s187_s27 }
  0x33   :  { %193 = dma.hbm_to_vmem [thread:$0]  %s186_s10, 512, %s188_s27, [#allocation24], %s1419_s22, %s1419_s22, %s1420_s2  }
  0x34   :  { %1386 = dma.done.wait [#allocation6], 256  }
  0x35   :  { %1387 = vsyncadd [#allocation6], 4294967040 }
  0x36   :  { %1388 = dma.done.wait [#allocation9], 768  }
  0x37   :  { %1389 = vsyncadd [#allocation9], 4294966528 }
  0x38   :  { %1390 = dma.done.wait [#allocation12], 528  }
  0x39   :  { %1391 = vsyncadd [#allocation12], 4294966768 }
  0x3a   :  { %1392 = dma.done.wait [#allocation15], 272  }
  0x3b   :  { %1393 = vsyncadd [#allocation15], 4294967024 }
  0x3c   :  { %1394 = dma.done.wait [#allocation18], 528  }
  0x3d   :  { %1395 = vsyncadd [#allocation18], 4294966768 }
  0x3e   :  { %1396 = dma.done.wait [#allocation21], 272  }
  0x3f   :  { %1397 = vsyncadd [#allocation21], 4294967024 }
  0x40   :  { %1398 = dma.done.wait [#allocation24], 528  }
  0x41   :  { %1399 = vsyncadd [#allocation24], 4294966768  ;;  %vm285_vm0 = vcmask 123904   ;;  %v1435_v0 = vmov 0.0   ;;  %s1855_s22 = sld [smem:[#allocation36_spill]]  ;;  %v1622_v2 = vld [vmem:[#allocation8] sm:$0xff] }
  0x42   :  { %286 = vst.msk [vmem:[#allocation4] sm:$0x3] %vm285_vm0, %v1435_v0  ;;  %v1624_v3 = vld [vmem:[#allocation8 + $0x8] sm:$0xff]  ;;  %v1626_v4 = vld [vmem:[#allocation8 + $0x10] sm:$0xff]  ;;  %v1628_v5 = vld [vmem:[#allocation8 + $0x18] sm:$0xff]  ;;  %s1701_s13 = smov 0  }
  0x43   :  { %v1630_v6 = vld [vmem:[#allocation10] sm:$0xff]  ;;  %v1632_v7 = vld [vmem:[#allocation10 + $0x8] sm:$0xff]  ;;  %v1639_v9 = vld [vmem:[#allocation11] sm:$0x1] }
  0x44   :  { %v1637_v8 = vld [vmem:[%s1835_s4] sm:$0x1]  ;;  %v1641_v10 = vld [vmem:[#allocation13] sm:$0xff]  ;;  %v1643_v11 = vld [vmem:[#allocation13 + $0x8] sm:$0xff] }
  0x45   :  { %v1645_v12 = vld [vmem:[#allocation13 + $0x10] sm:$0xff]  ;;  %v1647_v13 = vld [vmem:[#allocation13 + $0x18] sm:$0xff]  ;;  %v1649_v14 = vld [vmem:[#allocation14] sm:$0xff] }
  0x46   :  { %v1651_v15 = vld [vmem:[#allocation14 + $0x8] sm:$0xff]  ;;  %v1653_v16 = vld [vmem:[#allocation16] sm:$0x1]  ;;  %v1655_v17 = vld [vmem:[#allocation17] sm:$0x1] }
  0x47   :  { %v1620_v1 = vld [vmem:[%s1855_s22] sm:$0x3]  ;;  %v1657_v18 = vld [vmem:[#allocation19] sm:$0xff]  ;;  %v1661_v20 = vld [vmem:[#allocation19 + $0x10] sm:$0xff] }
  0x48   :  { %v1659_v19 = vld [vmem:[#allocation19 + $0x8] sm:$0xff]  ;;  %v1663_v21 = vld [vmem:[#allocation19 + $0x18] sm:$0xff]  ;;  %v1665_v22 = vld [vmem:[#allocation20] sm:$0xff] }
  0x49   :  { %v1667_v23 = vld [vmem:[#allocation20 + $0x8] sm:$0xff]  ;;  %v1669_v24 = vld [vmem:[#allocation22] sm:$0x1]  ;;  %v1671_v25 = vld [vmem:[#allocation23] sm:$0x1] }
  0x4a   :  { %v1673_v26 = vld [vmem:[#allocation25] sm:$0xff]  ;;  %v1675_v27 = vld [vmem:[#allocation25 + $0x8] sm:$0xff]  ;;  %v1677_v28 = vld [vmem:[#allocation25 + $0x10] sm:$0xff] }
  0x4b   :  { %v1679_v29 = vld [vmem:[#allocation25 + $0x18] sm:$0xff]  ;;  %v1694_v32 = vld [vmem:[%s1847_s16] sm:$0x1] }
  0x4c   :  { %v1684_v30 = vld [vmem:[%s1846_s15] sm:$0xff]  ;;  %v1689_v31 = vld [vmem:[%s1846_s15 + $0x8] sm:$0xff] }
  0x4d   :  { %v1699_v33 = vld [vmem:[%s1848_s17] sm:$0x1] }
  0x4e LB: > { %317 = vmatpush.msra.mxu0 %v1628_v5  ;;  %347 = vmatpush.msra.mxu1 %v1632_v7  ;;  %v325_v34 = vld [vmem:[#allocation4] sm:$0x3]  ;;  %vm329_vm1 = vcmask 130048   ;;  %s913_s15 = sshll.u32 %s1404_s13, 1  ;;  %vm301_vm2 = vcmask 261120   ;;  %v327_v36 = vperm.slane %v1639_v9, 0  ;;  %v293_v58 = vstv %s1404_s13  ;;  %s1404_s13 = sphi %s1701_s13, %s292_s13  }
  0x4f   : > { %s296_s16 = scalar_lea.vmem [#allocation5], %s913_s15  ;;  %s1436_s17 = smov 96   ;;  %v299_v39 = vperm.slane %v1637_v8, 0  ;;  %v1438_v59 = vmov 0   ;;  %vm294_vm7 = vcmp.lt.s32.totalorder %v293_v58, %v1620_v1 }
  0x50   : > { %318 = vmatpush.msra.mxu0 %v1626_v4  ;;  %348 = vmatpush.msra.mxu1 %v1630_v6  ;;  %v297_v35 = vld [vmem:[%s296_s16] sm:$0x3]  ;;  %s1437_s19 = smov 32   ;;  %v395_v60 = vsel %vm294_vm7, 1, %v1438_v59  ;;  %s1439_s8 = smov 112  }
  0x51   : > { %915 = vmatmul.msk.f32.vlgmr.msra.gmra.mxu1 %vm329_vm1, %v325_v34  ;;  %1002 = vset.pattern.permute.xlu2 %v1438_v59  ;;  %s1440_s20 = smov 16   ;;  %s411_s7 = scalar_lea.vmem [#allocation2], %s913_s15 }
  0x52   : > { %319 = vmatpush.msra.mxu0 %v1624_v3  ;;  %1003 = vset.pattern.permute.xlu0 %v1438_v59  ;;  %s292_s13 = sadd.s32 1, %s1404_s13  }
  0x53   : > { %397 = vperm.xlu2 %1002, %v395_v60   ;;  %p289_p0 = scmp.ge.s32.totalorder %s292_s13, 8  }
  0x54   : > { %320 = vmatpush.msra.mxu0 %v1622_v2  ;;  %s1730_s24 = smov (%p289_p0), 0  }
  0x55   : > { %914 = vmatmul.msk.f32.vlgmr.msra.gmra.mxu0 %vm301_vm2, %v297_v35 }
  0xce   : > { %v350_v37 = vpop.f32.mrf.mxu1 }
  0xcf   : > { %v351_v38 = vadd.f32 %v350_v37, %v327_v36  ;;  %v398_v37 = vpop.permute.xlu2 %397 }
  0xd0   : > { %vm399_vm8 = vcmp.eq.s32.totalorder %v398_v37, 1 }
  0xd1   : > { %374 = vrot.lane.b32.xlu0 %v351_v38, %s1436_s17 }
  0xd2   : > { %v322_v40 = vpop.f32.mrf.mxu0 }
  0xd3   : > { %v323_v41 = vadd.f32 %v322_v40, %v299_v39 }
  0xd5   : > { %v353_v42 = vadd.f32 %v351_v38, %v323_v41 }
  0xd7   : > { %v916_v43 = vmul.f32 -1.442695, %v353_v42 }
  0xd9   : > { %1004 = vpow2.f32 %v916_v43 }
  0xdf   : > { %v1005_v44 = vpop.eup %1004 }
  0xe0   : > { %v357_v45 = vadd.f32 1.0, %v1005_v44 }
  0xe2   : > { %1006 = vrcp.f32 %v357_v45  ;;  %v369_v51 = vand.u32 2147483648, %v357_v45  ;;  %vm363_vm4 = vweird.f32 %v357_v45  ;;  %v367_v52 = vand.u32 2147483647, %v357_v45 }
  0xe4   : > { %v370_v54 = vor.u32 1.1754944e-38, %v369_v51  ;;  %vm368_vm6 = vcmp.eq.f32.partialorder %v367_v52, 8.507059e+37 }
  0xe8   : > { %v1007_v46 = vpop.eup %1006 }
  0xe9   : > { %v359_v47 = vmul.f32 %v1007_v46, %v357_v45  ;;  %vm364_vm3 = vweird.f32 %v1007_v46 }
  0xea   : > { %vm365_vm5 = vmor %vm363_vm4, %vm364_vm3 }
  0xeb   : > { %v360_v48 = vsub.f32 1.0, %v359_v47 }
  0xed   : > { %v361_v49 = vmul.f32 %v1007_v46, %v360_v48 }
  0xef   : > { %v362_v50 = vadd.f32 %v1007_v46, %v361_v49 }
  0xf1   : > { %v366_v53 = vsel %vm365_vm5, %v1007_v46, %v362_v50 }
  0xf2   : > { %v371_v56 = vsel %vm368_vm6, %v370_v54, %v366_v53 }
  0xf3   : > { %v384_v36 = vsub.f32 1.0, %v371_v56 }
 0x143   : > { %v375_v55 = vpop.permute.xlu0 %374 }
 0x144   : > { %v377_v57 = vmul.f32 %v375_v55, %v371_v56 }
 0x146   : > { %379 = vrot.lane.b32.xlu0 %v377_v57, %s1437_s19 }
 0x1b8   : > { %v380_v61 = vpop.permute.xlu0 %379 }
 0x1b9   : > { %v382_v62 = vadd.f32 %v380_v61, %v323_v41 }
 0x1bb   : > { %1008 = vtanh.f32 %v382_v62 }
 0x1c1   : > { %v1009_v63 = vpop.eup %1008 }
 0x1c2   : > { %386 = vrot.lane.b32.xlu1 %v1009_v63, %s1439_s8 }
 0x1ca   : > { %390 = vrot.lane.b32.xlu1 %v325_v34, %s1440_s20 }
 0x234   : > { %v387_v35 = vpop.permute.xlu1 %386 }
 0x235   : > { %v389_v39 = vmul.f32 %v387_v35, %v384_v36 }
 0x23c   : > { %v391_v38 = vpop.permute.xlu1 %390 }
 0x23d   : > { %v393_v40 = vmul.f32 %v391_v38, %v371_v56 }
 0x23f   : > { %v394_v42 = vadd.f32 %v393_v40, %v389_v39 }
 0x241   : > { %v406_v43 = vsel %vm399_vm8, %v394_v42, 0.0  ;;  %v400_v44 = vsel %vm399_vm8, %v394_v42, %v391_v38 }
 0x242   : > { %408 = vrot.lane.b32.xlu0 %v406_v43, %s1439_s8  ;;  %402 = vrot.lane.b32.xlu2 %v400_v44, %s1439_s8 }
 0x29c   : > { %v403_v41 = vpop.permute.xlu2 %402 }
 0x29d   : > { %405 = vst.msk [vmem:[#allocation4] sm:$0x3] %vm285_vm0, %v403_v41 }
 0x29e   :  { %413 = vst.msk [vmem:[#allocation4] sm:$0x3] (%p289_p0), %vm285_vm0, %v1435_v0 }
 0x2b1   :  { %291 = sbr.rel (!%p289_p0) target bundleno = 78 (0x4e), region = 182 }
 0x2b4   : > { %v409_v45 = vpop.permute.xlu0 %408 }
 0x2b5   : > { %412 = vst.msk [vmem:[%s411_s7] sm:$0x3] %vm285_vm0, %v409_v45 }
 0x2b6 LB: > { %445 = vmatpush.msra.mxu0 %v1647_v13  ;;  %475 = vmatpush.msra.mxu1 %v1651_v15  ;;  %v453_v34 = vld [vmem:[#allocation4] sm:$0x3]  ;;  %s420_s25 = ssub.s32 7, %s1408_s24  ;;  %v455_v3 = vperm.slane %v1655_v17, 0  ;;  %s1441_s10 = smov 96   ;;  %v427_v6 = vperm.slane %v1653_v16, 0  ;;  %s1408_s24 = sphi %s1730_s24, %s419_s24  }
 0x2b7   : > { %s1743_s26 = sshll.u32 %s420_s25, 1  ;;  %s1442_s3 = smov 32   ;;  %v421_v61 = vstv %s420_s25  ;;  %v1443_v62 = vmov 0  }
 0x2b8   : > { %446 = vmatpush.msra.mxu0 %v1645_v12  ;;  %476 = vmatpush.msra.mxu1 %v1649_v14  ;;  %s424_s9 = scalar_lea.vmem [#allocation5], %s1743_s26  ;;  %vm422_vm13 = vcmp.lt.s32.totalorder %v421_v61, %v1620_v1  ;;  %s1444_s27 = smov 112  }
 0x2b9   : > { %919 = vmatmul.msk.f32.vlgmr.msra.gmra.mxu1 %vm329_vm1, %v453_v34  ;;  %v425_v2 = vld [vmem:[%s424_s9] sm:$0x3]  ;;  %1010 = vset.pattern.permute.xlu2 %v1443_v62  ;;  %v523_v63 = vsel %vm422_vm13, 1, %v1443_v62  ;;  %s1445_s12 = smov 16   ;;  %s539_s14 = scalar_lea.vmem [#allocation3], %s1743_s26 }
 0x2ba   : > { %447 = vmatpush.msra.mxu0 %v1643_v11  ;;  %1011 = vset.pattern.permute.xlu0 %v1443_v62  ;;  %s419_s24 = sadd.s32 1, %s1408_s24  }
 0x2bb   : > { %525 = vperm.xlu2 %1010, %v523_v63   ;;  %p416_p1 = scmp.ge.s32.totalorder %s419_s24, 8  }
 0x2bc   : > { %448 = vmatpush.msra.mxu0 %v1641_v10  ;;  %s1762_s22 = smov (%p416_p1), 0  }
 0x2bd   : > { %918 = vmatmul.msk.f32.vlgmr.msra.gmra.mxu0 %vm301_vm2, %v425_v2 }
 0x315   : > { %v526_v40 = vpop.permute.xlu2 %525 }
 0x316   : > { %vm527_vm14 = vcmp.eq.s32.totalorder %v526_v40, 1 }
 0x336   : > { %v478_v4 = vpop.f32.mrf.mxu1 }
 0x337   : > { %v479_v5 = vadd.f32 %v478_v4, %v455_v3 }
 0x339   : > { %502 = vrot.lane.b32.xlu0 %v479_v5, %s1441_s10 }
 0x33a   : > { %v450_v7 = vpop.f32.mrf.mxu0 }
 0x33b   : > { %v451_v8 = vadd.f32 %v450_v7, %v427_v6 }
 0x33d   : > { %v481_v9 = vadd.f32 %v479_v5, %v451_v8 }
 0x33f   : > { %v920_v46 = vmul.f32 -1.442695, %v481_v9 }
 0x341   : > { %1012 = vpow2.f32 %v920_v46 }
 0x347   : > { %v1013_v47 = vpop.eup %1012 }
 0x348   : > { %v485_v48 = vadd.f32 1.0, %v1013_v47 }
 0x34a   : > { %1014 = vrcp.f32 %v485_v48  ;;  %v497_v54 = vand.u32 2147483648, %v485_v48  ;;  %vm491_vm10 = vweird.f32 %v485_v48  ;;  %v495_v55 = vand.u32 2147483647, %v485_v48 }
 0x34c   : > { %v498_v57 = vor.u32 1.1754944e-38, %v497_v54  ;;  %vm496_vm12 = vcmp.eq.f32.partialorder %v495_v55, 8.507059e+37 }
 0x350   : > { %v1015_v49 = vpop.eup %1014 }
 0x351   : > { %v487_v50 = vmul.f32 %v1015_v49, %v485_v48  ;;  %vm492_vm9 = vweird.f32 %v1015_v49 }
 0x352   : > { %vm493_vm11 = vmor %vm491_vm10, %vm492_vm9 }
 0x353   : > { %v488_v51 = vsub.f32 1.0, %v487_v50 }
 0x355   : > { %v489_v52 = vmul.f32 %v1015_v49, %v488_v51 }
 0x357   : > { %v490_v53 = vadd.f32 %v1015_v49, %v489_v52 }
 0x359   : > { %v494_v56 = vsel %vm493_vm11, %v1015_v49, %v490_v53 }
 0x35a   : > { %v499_v59 = vsel %vm496_vm12, %v498_v57, %v494_v56 }
 0x35b   : > { %v512_v39 = vsub.f32 1.0, %v499_v59 }
 0x3ab   : > { %v503_v58 = vpop.permute.xlu0 %502 }
 0x3ac   : > { %v505_v60 = vmul.f32 %v503_v58, %v499_v59 }
 0x3ae   : > { %507 = vrot.lane.b32.xlu0 %v505_v60, %s1442_s3 }
 0x420   : > { %v508_v35 = vpop.permute.xlu0 %507 }
 0x421   : > { %v510_v36 = vadd.f32 %v508_v35, %v451_v8 }
 0x423   : > { %1016 = vtanh.f32 %v510_v36 }
 0x429   : > { %v1017_v37 = vpop.eup %1016 }
 0x42a   : > { %514 = vrot.lane.b32.xlu1 %v1017_v37, %s1444_s27 }
 0x432   : > { %518 = vrot.lane.b32.xlu1 %v453_v34, %s1445_s12 }
 0x49c   : > { %v515_v38 = vpop.permute.xlu1 %514 }
 0x49d   : > { %v517_v43 = vmul.f32 %v515_v38, %v512_v39 }
 0x4a4   : > { %v519_v42 = vpop.permute.xlu1 %518 }
 0x4a5   : > { %v521_v44 = vmul.f32 %v519_v42, %v499_v59 }
 0x4a7   : > { %v522_v41 = vadd.f32 %v521_v44, %v517_v43 }
 0x4a9   : > { %v534_v45 = vsel %vm527_vm14, %v522_v41, 0.0  ;;  %v528_v2 = vsel %vm527_vm14, %v522_v41, %v519_v42 }
 0x4aa   : > { %536 = vrot.lane.b32.xlu0 %v534_v45, %s1444_s27  ;;  %530 = vrot.lane.b32.xlu2 %v528_v2, %s1444_s27 }
 0x504   : > { %v531_v3 = vpop.permute.xlu2 %530 }
 0x505   : > { %533 = vst.msk [vmem:[#allocation4] sm:$0x3] %vm285_vm0, %v531_v3 }
 0x506   :  { %541 = vst.msk [vmem:[#allocation4] sm:$0x3] (%p416_p1), %vm285_vm0, %v1435_v0 }
 0x519   :  { %418 = sbr.rel (!%p416_p1) target bundleno = 694 (0x2b6), region = 193 }
 0x51c   : > { %v537_v4 = vpop.permute.xlu0 %536 }
 0x51d   : > { %540 = vst.msk [vmem:[%s539_s14] sm:$0x3] %vm285_vm0, %v537_v4 }
 0x51e LB: > { %627 = vmatpush.msra.mxu2 %v1667_v23  ;;  %v606_v34 = vld [vmem:[#allocation4] sm:$0x3]  ;;  %573 = vmatpush.msra.mxu0 %v1663_v21  ;;  %s1773_s2 = sshll.u32 %s1412_s22, 1  ;;  %v608_v12 = vperm.slane %v1671_v25, 0  ;;  %s1446_s29 = smov 96   ;;  %v603_v5 = vperm.slane %v1669_v24, 0  ;;  %v548_v59 = vstv %s1412_s22  ;;  %s1412_s22 = sphi %s1762_s22, %s547_s22  }
 0x51f   : > { %596 = vmatpush.msra.mxu1 %v1659_v19  ;;  %s553_s28 = scalar_lea.vmem [#allocation3], %s1773_s2  ;;  %s551_s4 = scalar_lea.vmem [#allocation2], %s1773_s2  ;;  %v1448_v60 = vmov 0   ;;  %vm549_vm5 = vcmp.lt.s32.totalorder %v548_v59, %v1620_v1 }
 0x520   : > { %628 = vmatpush.msra.mxu2 %v1665_v22  ;;  %574 = vmatpush.msra.mxu0 %v1661_v20  ;;  %v552_v11 = vld [vmem:[%s551_s4] sm:$0x3]  ;;  %s1447_s0 = smov 32   ;;  %v675_v61 = vsel %vm549_vm5, 1, %v1448_v60  ;;  %s1449_s11 = smov 112  }
 0x521   : > { %924 = vmatmul.msk.f32.vlgmr.msra.gmra.mxu2 %vm329_vm1, %v606_v34  ;;  %597 = vmatpush.msra.mxu1 %v1657_v18  ;;  %s1450_s6 = smov 16   ;;  %s691_s1 = scalar_lea.vmem [#allocation26], %s1773_s2 }
 0x522   : > { %923 = vmatmul.msk.f32.vlgmr.msra.gmra.mxu1 %vm329_vm1, %v552_v11  ;;  %1018 = vset.pattern.permute.xlu2 %v1448_v60  ;;  %s547_s22 = sadd.s32 1, %s1412_s22  }
 0x523   : > { %1019 = vset.pattern.permute.xlu0 %v1448_v60  ;;  %677 = vperm.xlu2 %1018, %v675_v61   ;;  %p544_p2 = scmp.ge.s32.totalorder %s547_s22, 8  }
 0x524   : > { %v554_v10 = vld [vmem:[%s553_s28] sm:$0x3]  ;;  %s1793_s5 = smov (%p544_p2), 0  }
 0x525   : > { %922 = vmatmul.msk.f32.vlgmr.msra.gmra.mxu0 %vm329_vm1, %v554_v10 }
 0x57d   : > { %v678_v38 = vpop.permute.xlu2 %677 }
 0x57e   : > { %vm679_vm6 = vcmp.eq.s32.totalorder %v678_v38, 1 }
 0x59f   : > { %v599_v16 = vpop.f32.mrf.mxu1 }
 0x5a2   : > { %v576_v15 = vpop.f32.mrf.mxu0 }
 0x5a3   : > { %v600_v17 = vadd.f32 %v599_v16, %v576_v15 }
 0x5a4   : > { %v630_v13 = vpop.f32.mrf.mxu2 }
 0x5a5   : > { %v631_v14 = vadd.f32 %v630_v13, %v608_v12  ;;  %v605_v6 = vadd.f32 %v603_v5, %v600_v17 }
 0x5a7   : > { %654 = vrot.lane.b32.xlu0 %v631_v14, %s1446_s29  ;;  %v633_v7 = vadd.f32 %v631_v14, %v605_v6 }
 0x5a9   : > { %v925_v8 = vmul.f32 -1.442695, %v633_v7 }
 0x5ab   : > { %1020 = vpow2.f32 %v925_v8 }
 0x5b1   : > { %v1021_v9 = vpop.eup %1020 }
 0x5b2   : > { %v637_v46 = vadd.f32 1.0, %v1021_v9 }
 0x5b4   : > { %1022 = vrcp.f32 %v637_v46  ;;  %v649_v52 = vand.u32 2147483648, %v637_v46  ;;  %vm643_vm2 = vweird.f32 %v637_v46  ;;  %v647_v53 = vand.u32 2147483647, %v637_v46 }
 0x5b6   : > { %v650_v55 = vor.u32 1.1754944e-38, %v649_v52  ;;  %vm648_vm4 = vcmp.eq.f32.partialorder %v647_v53, 8.507059e+37 }
 0x5ba   : > { %v1023_v47 = vpop.eup %1022 }
 0x5bb   : > { %v639_v48 = vmul.f32 %v1023_v47, %v637_v46  ;;  %vm644_vm15 = vweird.f32 %v1023_v47 }
 0x5bc   : > { %vm645_vm3 = vmor %vm643_vm2, %vm644_vm15 }
 0x5bd   : > { %v640_v49 = vsub.f32 1.0, %v639_v48 }
 0x5bf   : > { %v641_v50 = vmul.f32 %v1023_v47, %v640_v49 }
 0x5c1   : > { %v642_v51 = vadd.f32 %v1023_v47, %v641_v50 }
 0x5c3   : > { %v646_v54 = vsel %vm645_vm3, %v1023_v47, %v642_v51 }
 0x5c4   : > { %v651_v57 = vsel %vm648_vm4, %v650_v55, %v646_v54 }
 0x5c5   : > { %v664_v37 = vsub.f32 1.0, %v651_v57 }
 0x619   : > { %v655_v56 = vpop.permute.xlu0 %654 }
 0x61a   : > { %v657_v58 = vmul.f32 %v655_v56, %v651_v57 }
 0x61c   : > { %659 = vrot.lane.b32.xlu0 %v657_v58, %s1447_s0 }
 0x68e   : > { %v660_v62 = vpop.permute.xlu0 %659 }
 0x68f   : > { %v662_v63 = vadd.f32 %v660_v62, %v605_v6 }
 0x691   : > { %1024 = vtanh.f32 %v662_v63 }
 0x697   : > { %v1025_v35 = vpop.eup %1024 }
 0x698   : > { %666 = vrot.lane.b32.xlu1 %v1025_v35, %s1449_s11 }
 0x6a0   : > { %670 = vrot.lane.b32.xlu1 %v606_v34, %s1450_s6 }
 0x70a   : > { %v667_v36 = vpop.permute.xlu1 %666 }
 0x70b   : > { %v669_v40 = vmul.f32 %v667_v36, %v664_v37 }
 0x712   : > { %v671_v39 = vpop.permute.xlu1 %670 }
 0x713   : > { %v673_v42 = vmul.f32 %v671_v39, %v651_v57 }
 0x715   : > { %v674_v43 = vadd.f32 %v673_v42, %v669_v40 }
 0x717   : > { %v686_v44 = vsel %vm679_vm6, %v674_v43, 0.0  ;;  %v680_v41 = vsel %vm679_vm6, %v674_v43, %v671_v39 }
 0x718   : > { %688 = vrot.lane.b32.xlu0 %v686_v44, %s1449_s11  ;;  %682 = vrot.lane.b32.xlu2 %v680_v41, %s1449_s11 }
 0x772   : > { %v683_v45 = vpop.permute.xlu2 %682 }
 0x773   : > { %685 = vst.msk [vmem:[#allocation4] sm:$0x3] %vm285_vm0, %v683_v45 }
 0x774   :  { %693 = vst.msk [vmem:[#allocation4] sm:$0x3] (%p544_p2), %vm285_vm0, %v1435_v0 }
 0x787   :  { %546 = sbr.rel (!%p544_p2) target bundleno = 1310 (0x51e), region = 204 }
 0x78a   : > { %v689_v2 = vpop.permute.xlu0 %688 }
 0x78b   : > { %692 = vst.msk [vmem:[%s691_s1] sm:$0x3] %vm285_vm0, %v689_v2 }
 0x78c LB: > { %780 = vmatpush.msra.mxu2 %v1689_v31  ;;  %v759_v3 = vld [vmem:[#allocation4] sm:$0x3]  ;;  %726 = vmatpush.msra.mxu0 %v1679_v29  ;;  %s700_s30 = ssub.s32 7, %s1416_s5  ;;  %v761_v19 = vperm.slane %v1699_v33, 0  ;;  %s1451_s17 = smov 96   ;;  %v756_v25 = vperm.slane %v1694_v32, 0  ;;  %s1416_s5 = sphi %s1793_s5, %s699_s5  }
 0x78d   : > { %749 = vmatpush.msra.mxu1 %v1675_v27  ;;  %s1808_s13 = sshll.u32 %s700_s30, 1  ;;  %s1452_s19 = smov 32   ;;  %v701_v48 = vstv %s700_s30  ;;  %v1453_v49 = vmov 0  }
 0x78e   : > { %781 = vmatpush.msra.mxu2 %v1684_v30  ;;  %727 = vmatpush.msra.mxu0 %v1677_v28  ;;  %s706_s15 = scalar_lea.vmem [#allocation3], %s1808_s13  ;;  %s704_s16 = scalar_lea.vmem [#allocation2], %s1808_s13  ;;  %vm702_vm11 = vcmp.lt.s32.totalorder %v701_v48, %v1620_v1 }
 0x78f   : > { %929 = vmatmul.msk.f32.vlgmr.msra.gmra.mxu2 %vm329_vm1, %v759_v3  ;;  %750 = vmatpush.msra.mxu1 %v1673_v26  ;;  %v707_v0 = vld [vmem:[%s706_s15] sm:$0x3]  ;;  %v828_v50 = vsel %vm702_vm11, 1, %v1453_v49  ;;  %s1454_s8 = smov 112   ;;  %s1455_s20 = smov 16  }
 0x790   : > { %v705_v18 = vld [vmem:[%s704_s16] sm:$0x3]  ;;  %927 = vmatmul.msk.f32.vlgmr.msra.gmra.mxu0 %vm329_vm1, %v707_v0  ;;  %1026 = vset.pattern.permute.xlu2 %v1453_v49  ;;  %s839_s7 = scalar_lea.vmem [#allocation26], %s1808_s13  ;;  %s699_s5 = sadd.s32 1, %s1416_s5  }
 0x791   : > { %928 = vmatmul.msk.f32.vlgmr.msra.gmra.mxu1 %vm329_vm1, %v705_v18  ;;  %1027 = vset.pattern.permute.xlu0 %v1453_v49  ;;  %p696_p3 = scmp.ge.s32.totalorder %s699_s5, 8  }
 0x792   : > { %830 = vperm.xlu2 %1026, %v828_v50   ;;  %v840_v63 = vld [vmem:[%s839_s7] sm:$0x3]  ;;  %s854_s26 = sshll.u32 (%p696_p3), %s1849_s18, 4  ;;  %s1456_s9 = smov (%p696_p3), [#allocation26]   ;;  %s855_s26 = int_to_ptr.hbm [resolvable:$true] %s854_s26 }
 0x793   :  { %s852_s10 = sshll.u32 (%p696_p3), %s1456_s9, 4  ;;  %s853_s10 = int_to_ptr.vmem [resolvable:$true] %s852_s10 }
 0x7ec   : > { %v831_v56 = vpop.permute.xlu2 %830 }
 0x7ed   : > { %vm832_vm12 = vcmp.eq.s32.totalorder %v831_v56, 1 }
 0x80d   : > { %v729_v22 = vpop.f32.mrf.mxu0 }
 0x80e   : > { %v752_v23 = vpop.f32.mrf.mxu1 }
 0x80f   : > { %v753_v24 = vadd.f32 %v752_v23, %v729_v22 }
 0x811   : > { %v758_v4 = vadd.f32 %v756_v25, %v753_v24 }
 0x812   : > { %v783_v20 = vpop.f32.mrf.mxu2 }
 0x813   : > { %v784_v21 = vadd.f32 %v783_v20, %v761_v19 }
 0x815   : > { %807 = vrot.lane.b32.xlu0 %v784_v21, %s1451_s17  ;;  %v786_v34 = vadd.f32 %v784_v21, %v758_v4 }
 0x817   : > { %v930_v10 = vmul.f32 -1.442695, %v786_v34 }
 0x819   : > { %1028 = vpow2.f32 %v930_v10 }
 0x81f   : > { %v1029_v11 = vpop.eup %1028 }
 0x820   : > { %v790_v12 = vadd.f32 1.0, %v1029_v11 }
 0x822   : > { %1030 = vrcp.f32 %v790_v12  ;;  %v802_v5 = vand.u32 2147483648, %v790_v12  ;;  %vm796_vm8 = vweird.f32 %v790_v12  ;;  %v800_v6 = vand.u32 2147483647, %v790_v12 }
 0x824   : > { %v803_v8 = vor.u32 1.1754944e-38, %v802_v5  ;;  %vm801_vm10 = vcmp.eq.f32.partialorder %v800_v6, 8.507059e+37 }
 0x828   : > { %v1031_v13 = vpop.eup %1030 }
 0x829   : > { %v792_v14 = vmul.f32 %v1031_v13, %v790_v12  ;;  %vm797_vm7 = vweird.f32 %v1031_v13 }
 0x82a   : > { %vm798_vm9 = vmor %vm796_vm8, %vm797_vm7 }
 0x82b   : > { %v793_v15 = vsub.f32 1.0, %v792_v14 }
 0x82d   : > { %v794_v16 = vmul.f32 %v1031_v13, %v793_v15 }
 0x82f   : > { %v795_v17 = vadd.f32 %v1031_v13, %v794_v16 }
 0x831   : > { %v799_v7 = vsel %vm798_vm9, %v1031_v13, %v795_v17 }
 0x832   : > { %v804_v46 = vsel %vm801_vm10, %v803_v8, %v799_v7 }
 0x833   : > { %v817_v55 = vsub.f32 1.0, %v804_v46 }
 0x887   : > { %v808_v9 = vpop.permute.xlu0 %807 }
 0x888   : > { %v810_v47 = vmul.f32 %v808_v9, %v804_v46 }
 0x88a   : > { %812 = vrot.lane.b32.xlu0 %v810_v47, %s1452_s19 }
 0x8fc   : > { %v813_v51 = vpop.permute.xlu0 %812 }
 0x8fd   : > { %v815_v52 = vadd.f32 %v813_v51, %v758_v4 }
 0x8ff   : > { %1032 = vtanh.f32 %v815_v52 }
 0x905   : > { %v1033_v53 = vpop.eup %1032 }
 0x906   : > { %819 = vrot.lane.b32.xlu1 %v1033_v53, %s1454_s8 }
 0x90e   : > { %823 = vrot.lane.b32.xlu1 %v759_v3, %s1455_s20 }
 0x978   : > { %v820_v54 = vpop.permute.xlu1 %819 }
 0x979   : > { %v822_v58 = vmul.f32 %v820_v54, %v817_v55 }
 0x980   : > { %v824_v57 = vpop.permute.xlu1 %823 }
 0x981   : > { %v826_v59 = vmul.f32 %v824_v57, %v804_v46 }
 0x983   : > { %v827_v60 = vadd.f32 %v826_v59, %v822_v58 }
 0x985   : > { %v841_v61 = vsel %vm832_vm12, %v827_v60, 0.0  ;;  %v833_v62 = vsel %vm832_vm12, %v827_v60, %v824_v57 }
 0x986   : > { %843 = vrot.lane.b32.xlu2 %v841_v61, %s1454_s8  ;;  %835 = vrot.lane.b32.xlu0 %v833_v62, %s1454_s8 }
 0x9e0   : > { %v844_v35 = vpop.permute.xlu2 %843 }
 0x9e1   : > { %v846_v36 = vadd.f32 %v844_v35, %v840_v63 }
 0x9e3   : > { %847 = vst.msk [vmem:[%s839_s7] sm:$0x3] %vm285_vm0, %v846_v36 }
 0x9e4   :  { %860 = dma.vmem_to_hbm [thread:$0]  (%p696_p3), %s853_s10, 256, %s855_s26, [#allocation7], %s1427_s23, %s1427_s23, %s1428_s21  }
 0x9f5   :  { %698 = sbr.rel (!%p696_p3) target bundleno = 1932 (0x78c), region = 215 }
 0x9f8   : > { %v836_v37 = vpop.permute.xlu0 %835 }
 0x9f9   : > { %838 = vst.msk [vmem:[#allocation4] sm:$0x3] %vm285_vm0, %v836_v37 }
 0x9fa   :  { %1400 = dma.done.wait [#allocation7], 256  }
 0x9fb   :  { %1401 = vsyncadd [#allocation7], 4294967040 }
 0x9fc   :  { %865 = vsyncpa [#allocation6], 1 }
 0x9fd   :  { %866 = vsyncpa [#allocation9], 1 }
 0x9fe   :  { %867 = vsyncpa [#allocation12], 1 }
 0x9ff   :  { %868 = vsyncpa [#allocation15], 1 }
 0xa00   :  { %869 = vsyncpa [#allocation18], 1 }
 0xa01   :  { %870 = vsyncpa [#allocation21], 1 }
 0xa02   :  { %871 = vsyncpa [#allocation24], 1 }
 0xa03   :  { %872 = vsyncpa [#allocation7], 1 }

</bundles_post_ra>
